<compile_context>
chip_gen: v7x
topology: tpu7x:2x2x1
jax: 0.10.0
libtpu: 0.0.40
codegen_flags: <defaults>
</compile_context>

<pallas_src>
import functools

import numpy as np
import jax
import jax.numpy as jnp
from jax import lax
from jax.experimental import pallas as pl
from jax.experimental.pallas import tpu as pltpu


# trunk definition: (name, C_in, C_out, spatial H == W at that conv)
CONV_DEFS = (
    ("conv_1", 3, 8, 16),
    ("conv_2", 8, 8, 16),
    ("conv_3", 8, 16, 8),
    ("conv_4", 16, 16, 8),
    ("conv_5", 16, 32, 4),
)
CONTENT_LAYER = 3                       # conv_4 (pre-ReLU, standard Gatys placement)

# per-conv packing metadata (static)
CIN_P   = (8, 8, 8, 16, 16)             # input channels rounded up to sublane multiple
W_ROWS  = (0, 8, 16, 32, 48)            # row offset of each conv's weights in the slab
W_COLS  = (80, 80, 80, 152, 152)        # 9*cin_p + 8 (bias block)
SPATIAL = (16, 16, 8, 8, 4)             # H == W at that conv

# constants-slab row map (96 x 256)
_ROW_PROJ16 = 0    # rows 0..63,  cols 0..255 : transposed 16x16 -> 8x8 pool selection
_ROW_PROJ8  = 64   # rows 64..79, cols 0..63  : transposed  8x8 -> 4x4 pool selection
_COL_MEAN   = 64   # rows 64..71, col 64      : ImageNet mean column (channels 3..7 zero)
_ROW_ONES   = 80   # rows 80..87, cols 0..255 : bias block (row 80 = ones, rest zero)
_ROW_MASK   = 88   # rows 88..93 : mask_l16, mask_r16, mask_l8, mask_r8, mask_l4, mask_r4

# targets-slab row map (96 x 128): conv_4 feature + 5 Gram matrices
GRAM_ROWS = (16, 24, 32, 48, 64)

_VMEM = pl.BlockSpec(memory_space=pltpu.MemorySpace.VMEM)
_SMEM = pl.BlockSpec(memory_space=pltpu.MemorySpace.SMEM)


def _scratch_shapes():
    # one zero-bordered pad plane per spatial size; each is zeroed once per call
    return [pltpu.VMEM((8, 384), jnp.float32),     # 16x16 plane (border + 256 + border)
            pltpu.VMEM((16, 128), jnp.float32),    # 8x8 plane
            pltpu.VMEM((16, 128), jnp.float32)]    # 4x4 plane


# ---------------------------------------------------------------------------
# In-kernel building blocks (traced inside the fused kernels)
# ---------------------------------------------------------------------------

def _conv3x3(pad_ref, x, w, c_ref, W, cin):
    """3x3 SAME conv as ONE matmul on a channels-major flattened activation.

    x: (cin, H*W) value; w: (cout, 9*cin + 8) value (bias at column 9*cin).
    pad_ref: zero-bordered VMEM plane for this spatial size (borders stay zero).
    """
    H = W
    HW = H * W
    B = W + 1                                  # zero border wide enough for any tap
    pad_ref[0:cin, B:B + HW] = x

    if W == 16:
        ml, mr = c_ref[_ROW_MASK + 0:_ROW_MASK + 1, 0:HW], c_ref[_ROW_MASK + 1:_ROW_MASK + 2, 0:HW]
    elif W == 8:
        ml, mr = c_ref[_ROW_MASK + 2:_ROW_MASK + 3, 0:HW], c_ref[_ROW_MASK + 3:_ROW_MASK + 4, 0:HW]
    else:
        ml, mr = c_ref[_ROW_MASK + 4:_ROW_MASK + 5, 0:HW], c_ref[_ROW_MASK + 5:_ROW_MASK + 6, 0:HW]

    taps = []
    for kh in range(3):
        for kw in range(3):
            off = (kh - 1) * W + (kw - 1)
            xt = pad_ref[0:cin, B + off:B + off + HW]
            if kw == 0:
                xt = xt * ml                   # zero row-wrapped reads (left neighbor)
            elif kw == 2:
                xt = xt * mr                   # zero row-wrapped reads (right neighbor)
            taps.append(xt)
    taps.append(c_ref[_ROW_ONES:_ROW_ONES + 8, 0:HW])   # ones row -> bias via matmul
    stacked = jnp.concatenate(taps, axis=0)              # (9*cin + 8, HW)
    return jnp.dot(w, stacked, preferred_element_type=jnp.float32)


def _maxpool2(pad_ref, x, c_ref, W):
    """MaxPool2d(kernel=2, stride=2) on a (C, H*W) flattened activation."""
    C, HW = x.shape
    B = W + 1
    pad_ref[0:C, B:B + HW] = x
    m = jnp.maximum(
        jnp.maximum(pad_ref[0:C, B:B + HW], pad_ref[0:C, B + 1:B + 1 + HW]),
        jnp.maximum(pad_ref[0:C, B + W:B + W + HW],
                    pad_ref[0:C, B + W + 1:B + W + 1 + HW]))
    if W == 16:
        projT = c_ref[_ROW_PROJ16:_ROW_PROJ16 + 64, 0:256]     # (HWo, HW)
    else:
        projT = c_ref[_ROW_PROJ8:_ROW_PROJ8 + 16, 0:64]
    # (C, HW) x (HWo, HW)^T -> (C, HWo); precomputed 0/1 selection of even rows/cols
    return lax.dot_general(m, projT, (((1,), (1,)), ((), ())),
                           preferred_element_type=jnp.float32)


def _gram(f):
    # Gram = F @ F.T / (N*C*H*W), N == 1
    C, HW = f.shape
    g = lax.dot_general(f, f, (((1,), (1,)), ((), ())),
                        preferred_element_type=jnp.float32)
    return g * (1.0 / float(C * HW))


def _run_trunk(img, w_ref, c_ref, pad16, pad8, pad4, per_layer):
    """conv_1 relu conv_2 relu pool conv_3 relu conv_4 relu pool conv_5.
    Calls per_layer(idx, pre_relu_feature) right after each conv so features
    are consumed immediately (Gram / MSE) and die."""
    pads = (pad16, pad16, pad8, pad8, pad4)
    mean = c_ref[_ROW_PROJ8:_ROW_PROJ8 + 8, _COL_MEAN:_COL_MEAN + 1]   # (8, 1)
    # inv_std is folded into conv_1 weights (exact: scale commutes with zero pad)
    x = img - mean
    for li in range(5):
        cout = CONV_DEFS[li][2]
        w = w_ref[W_ROWS[li]:W_ROWS[li] + cout, 0:W_COLS[li]]
        f = _conv3x3(pads[li], x, w, c_ref, SPATIAL[li], CIN_P[li])
        per_layer(li, f)
        x = jnp.maximum(f, 0.0)
        if li == 1:
            x = _maxpool2(pad16, x, c_ref, 16)     # (8, 64)
        elif li == 3:
            x = _maxpool2(pad8, x, c_ref, 8)       # (16, 16)


# ---------------------------------------------------------------------------
# Fused kernels
# ---------------------------------------------------------------------------

def _forward_kernel(img_ref, w_ref, c_ref, t_ref, loss_ref, pad16, pad8, pad4):
    pad16[...] = jnp.zeros_like(pad16)
    pad8[...] = jnp.zeros_like(pad8)
    pad4[...] = jnp.zeros_like(pad4)

    acc = {"c": jnp.float32(0.0), "s": jnp.float32(0.0)}

    def per_layer(li, f):
        C, _ = f.shape
        r = GRAM_ROWS[li]
        dg = _gram(f) - t_ref[r:r + C, 0:C]
        acc["s"] = acc["s"] + jnp.sum(dg * dg) * (1.0 / float(C * C))
        if li == CONTENT_LAYER:
            d = f - t_ref[0:16, 0:64]
            acc["c"] = acc["c"] + jnp.sum(d * d) * (1.0 / float(f.size))

    _run_trunk(img_ref[...], w_ref, c_ref, pad16, pad8, pad4, per_layer)
    loss_ref[0, 0] = acc["c"]
    loss_ref[0, 1] = acc["s"]


def _targets_kernel(img_ref, w_ref, c_ref, tgt_ref, pad16, pad8, pad4):
    pad16[...] = jnp.zeros_like(pad16)
    pad8[...] = jnp.zeros_like(pad8)
    pad4[...] = jnp.zeros_like(pad4)
    tgt_ref[...] = jnp.zeros_like(tgt_ref)

    def per_layer(li, f):
        C = f.shape[0]
        r = GRAM_ROWS[li]
        tgt_ref[r:r + C, 0:C] = _gram(f)
        if li == CONTENT_LAYER:
            tgt_ref[0:16, 0:64] = f

    _run_trunk(img_ref[...], w_ref, c_ref, pad16, pad8, pad4, per_layer)


# ---------------------------------------------------------------------------
# Host-side packing (done once, outside the hot path)
# ---------------------------------------------------------------------------

def _prep_image(img):
    # (1, 3, H, W) -> channels-major flattened (8, H*W), channels zero-padded to 8
    _, C, H, W = img.shape
    x = img.reshape(C, H * W).astype(jnp.float32)
    return jnp.pad(x, ((0, 8 - C), (0, 0)))


def make_constants():
    """Constants slab (96, 256): pool projections (transposed), ImageNet mean,
    bias ones-block and row-wrap masks. Built once host-side (no in-kernel iota)."""
    c = np.zeros((96, 256), np.float32)

    def projT(W):
        Wo, HW, HWo = W // 2, W * W, (W // 2) * (W // 2)
        P = np.zeros((HWo, HW), np.float32)
        for o in range(HWo):
            r, col = o // Wo, o % Wo
            P[o, 2 * r * W + 2 * col] = 1.0
        return P

    c[_ROW_PROJ16:_ROW_PROJ16 + 64, 0:256] = projT(16)
    c[_ROW_PROJ8:_ROW_PROJ8 + 16, 0:64] = projT(8)
    c[_ROW_PROJ8:_ROW_PROJ8 + 3, _COL_MEAN] = np.array([0.485, 0.456, 0.406], np.float32)
    c[_ROW_ONES, 0:256] = 1.0

    def masks(W, HW):
        col = np.arange(HW) % W
        return (col >= 1).astype(np.float32), (col <= W - 2).astype(np.float32)

    c[_ROW_MASK + 0, 0:256], c[_ROW_MASK + 1, 0:256] = masks(16, 256)
    c[_ROW_MASK + 2, 0:64], c[_ROW_MASK + 3, 0:64] = masks(8, 64)
    c[_ROW_MASK + 4, 0:16], c[_ROW_MASK + 5, 0:16] = masks(4, 16)
    return jnp.asarray(c)


def prep_model(params):
    """Pack all conv weights+biases into ONE (80, 256) slab: per conv, rows
    [W_ROWS[i] : +C_out], cols [0 : 9*cin_p] tap-major weights, col 9*cin_p bias.
    ImageNet inv_std is folded into conv_1 (exact under zero padding)."""
    inv_std = jnp.array([1.0 / 0.229, 1.0 / 0.224, 1.0 / 0.225], jnp.float32)
    slab = jnp.zeros((80, 256), jnp.float32)
    for i, (name, cin, cout, _) in enumerate(CONV_DEFS):
        w = params[name + "_w"]                             # (cout, cin, 3, 3)
        b = params[name + "_b"]                             # (cout,)
        if i == 0:
            w = w * inv_std[None, :, None, None]
        cin_p = CIN_P[i]
        wt = jnp.transpose(w, (0, 2, 3, 1))                 # (cout, 3, 3, cin)
        wt = jnp.pad(wt, ((0, 0), (0, 0), (0, 0), (0, cin_p - cin)))
        wt = wt.reshape(cout, 9 * cin_p)                    # tap-major columns
        packed = jnp.concatenate(
            [wt, b[:, None], jnp.zeros((cout, 7), jnp.float32)], axis=1)
        packed = jnp.pad(packed, ((0, 0), (0, 256 - packed.shape[1])))
        slab = slab.at[W_ROWS[i]:W_ROWS[i] + cout, :].set(packed)
    return slab


# ---------------------------------------------------------------------------
# Wrappers
# ---------------------------------------------------------------------------

def init_targets(content_img, style_img, w_slab, c_slab):
    """Mirrors style_content_loss_module.init_features. grid=(2,) runs the two
    independent image passes in parallel on the two TensorCores on v7x."""
    imgs = jnp.stack([_prep_image(content_img), _prep_image(style_img)], axis=0)
    out = pl.pallas_call(
        _targets_kernel,
        grid=(2,),
        out_shape=jax.ShapeDtypeStruct((2, 96, 128), jnp.float32),
        in_specs=[pl.BlockSpec((None, 8, 256), lambda i: (i, 0, 0)),
                  pl.BlockSpec((80, 256), lambda i: (0, 0)),
                  pl.BlockSpec((96, 256), lambda i: (0, 0))],
        out_specs=pl.BlockSpec((None, 96, 128), lambda i: (i, 0, 0)),
        scratch_shapes=_scratch_shapes(),
        compiler_params=pltpu.CompilerParams(dimension_semantics=("parallel",)),
    )(imgs, w_slab, c_slab)
    # ct4 region from the content-image pass, Gram regions from the style pass
    return jnp.concatenate([out[0, 0:16, :], out[1, 16:96, :]], axis=0)


def style_content_loss_forward(data, w_slab, c_slab, targets):
    """Mirrors style_content_loss_module.forward -> (content_loss, style_loss).
    One fused, grid-less pallas_call: trunk + Grams + both MSE reductions."""
    img = _prep_image(data)
    losses = pl.pallas_call(
        _forward_kernel,
        out_shape=jax.ShapeDtypeStruct((1, 2), jnp.float32),
        in_specs=[_VMEM, _VMEM, _VMEM, _VMEM],
        out_specs=_SMEM,
        scratch_shapes=_scratch_shapes(),
        cost_estimate=pl.CostEstimate(flops=2_000_000, transcendentals=0,
                                      bytes_accessed=250_000),
    )(img, w_slab, c_slab, targets)
    return losses[0, 0], losses[0, 1]


# ---------------------------------------------------------------------------
# Deterministic parameter init (synthetic stand-in for model.pth)
# ---------------------------------------------------------------------------

def init_params(key):
    params = {}
    for i, (name, cin, cout, _) in enumerate(CONV_DEFS):
        kw, kb = jax.random.split(jax.random.fold_in(key, i))
        params[name + "_w"] = 0.1 * jax.random.normal(kw, (cout, cin, 3, 3), jnp.float32)
        params[name + "_b"] = 0.01 * jax.random.normal(kb, (cout,), jnp.float32)
    return params


if __name__ == "__main__":
    key = jax.random.PRNGKey(0)
    k_data, k_content, k_style, k_params = jax.random.split(key, 4)

    # style transfer: batch=1, 3 channels, 16x16 spatial
    content_img = jax.random.uniform(k_content, (1, 3, 16, 16), jnp.float32)
    style_img = jax.random.uniform(k_style, (1, 3, 16, 16), jnp.float32)
    data = jax.random.uniform(k_data, (1, 3, 16, 16), jnp.float32)

    params = init_params(k_params)
    w_slab = prep_model(params)
    c_slab = make_constants()

    targets = jax.jit(init_targets)(content_img, style_img, w_slab, c_slab)

    fwd = jax.jit(functools.partial(style_content_loss_forward,
                                    w_slab=w_slab, c_slab=c_slab, targets=targets))
    content_loss, style_loss = fwd(data)
    jax.block_until_ready((content_loss, style_loss))
    print("KERNEL_OK")
</pallas_src>

<mosaic_0001>
module attributes {stable_mosaic.version = 11 : i64} {
  func.func @_targets_kernel(%arg0: i32, %arg1: memref<1x8x256xf32, #tpu.memory_space<vmem>>, %arg2: memref<80x256xf32, #tpu.memory_space<vmem>>, %arg3: memref<96x256xf32, #tpu.memory_space<vmem>>, %arg4: memref<1x96x128xf32, #tpu.memory_space<vmem>>, %arg5: memref<8x384xf32, #tpu.memory_space<vmem>>, %arg6: memref<16x128xf32, #tpu.memory_space<vmem>>, %arg7: memref<16x128xf32, #tpu.memory_space<vmem>>) attributes {dimension_semantics = [#tpu.dimension_semantics<parallel>], iteration_bounds = array<i64: 2>, scalar_prefetch = 0 : i64, scratch_operands = 3 : i64, tpu.core_type = #tpu.core_type<tc>, window_params = [{transform_indices = @transform_0, window_bounds = array<i64: 1, 8, 256>}, {pipeline_mode = #tpu.pipeline_mode<synchronous>, transform_indices = @transform_1, window_bounds = array<i64: 80, 256>}, {pipeline_mode = #tpu.pipeline_mode<synchronous>, transform_indices = @transform_2, window_bounds = array<i64: 96, 256>}, {transform_indices = @transform_3, window_bounds = array<i64: 1, 96, 128>}]} {
    %cst = arith.constant 0.000000e+00 : f32
    %0 = vector.broadcast %cst : f32 to vector<8x384xf32>
    %c0 = arith.constant 0 : index
    %c0_0 = arith.constant 0 : index
    %1 = vector.load %arg5[%c0, %c0_0] : memref<8x384xf32, #tpu.memory_space<vmem>>, vector<8x384xf32>
    tpu.vector_store %arg5[%c0, %c0_0], %0 {strides = array<i32>} : memref<8x384xf32, #tpu.memory_space<vmem>>, vector<8x384xf32>,
    %cst_1 = arith.constant 0.000000e+00 : f32
    %2 = vector.broadcast %cst_1 : f32 to vector<16x128xf32>
    %c0_2 = arith.constant 0 : index
    %c0_3 = arith.constant 0 : index
    %3 = vector.load %arg6[%c0_2, %c0_3] : memref<16x128xf32, #tpu.memory_space<vmem>>, vector<16x128xf32>
    tpu.vector_store %arg6[%c0_2, %c0_3], %2 {strides = array<i32>} : memref<16x128xf32, #tpu.memory_space<vmem>>, vector<16x128xf32>,
    %cst_4 = arith.constant 0.000000e+00 : f32
    %4 = vector.broadcast %cst_4 : f32 to vector<16x128xf32>
    %c0_5 = arith.constant 0 : index
    %c0_6 = arith.constant 0 : index
    %5 = vector.load %arg7[%c0_5, %c0_6] : memref<16x128xf32, #tpu.memory_space<vmem>>, vector<16x128xf32>
    tpu.vector_store %arg7[%c0_5, %c0_6], %4 {strides = array<i32>} : memref<16x128xf32, #tpu.memory_space<vmem>>, vector<16x128xf32>,
    %cst_7 = arith.constant 0.000000e+00 : f32
    %6 = vector.broadcast %cst_7 : f32 to vector<96x128xf32>
    %c0_8 = arith.constant 0 : index
    %c0_9 = arith.constant 0 : index
    %c0_10 = arith.constant 0 : index
    %7 = vector.load %arg4[%c0_8, %c0_9, %c0_10] : memref<1x96x128xf32, #tpu.memory_space<vmem>>, vector<1x96x128xf32>
    %8 = vector.shape_cast %7 : vector<1x96x128xf32> to vector<96x128xf32>
    %9 = vector.shape_cast %6 : vector<96x128xf32> to vector<1x96x128xf32>
    tpu.vector_store %arg4[%c0_8, %c0_9, %c0_10], %9 {strides = array<i32>} : memref<1x96x128xf32, #tpu.memory_space<vmem>>, vector<1x96x128xf32>,
    %c0_11 = arith.constant 0 : index
    %c0_12 = arith.constant 0 : index
    %c0_13 = arith.constant 0 : index
    %10 = vector.load %arg1[%c0_11, %c0_12, %c0_13] : memref<1x8x256xf32, #tpu.memory_space<vmem>>, vector<1x8x256xf32>
    %11 = vector.shape_cast %10 : vector<1x8x256xf32> to vector<8x256xf32>
    %c64 = arith.constant 64 : index
    %c64_14 = arith.constant 64 : index
    %12 = vector.load %arg3[%c64, %c64_14] : memref<96x256xf32, #tpu.memory_space<vmem>>, vector<8x1xf32>
    %13 = vector.broadcast %12 : vector<8x1xf32> to vector<8x256xf32>
    %14 = arith.subf %11, %13 : vector<8x256xf32>
    %c0_15 = arith.constant 0 : index
    %c0_16 = arith.constant 0 : index
    %15 = vector.load %arg2[%c0_15, %c0_16] : memref<80x256xf32, #tpu.memory_space<vmem>>, vector<8x80xf32>
    %c0_17 = arith.constant 0 : index
    %c17 = arith.constant 17 : index
    %16 = vector.load %arg5[%c0_17, %c17] : memref<8x384xf32, #tpu.memory_space<vmem>>, vector<8x256xf32>
    tpu.vector_store %arg5[%c0_17, %c17], %14 {strides = array<i32>} : memref<8x384xf32, #tpu.memory_space<vmem>>, vector<8x256xf32>,
    %c88 = arith.constant 88 : index
    %c0_18 = arith.constant 0 : index
    %17 = vector.load %arg3[%c88, %c0_18] : memref<96x256xf32, #tpu.memory_space<vmem>>, vector<1x256xf32>
    %c89 = arith.constant 89 : index
    %c0_19 = arith.constant 0 : index
    %18 = vector.load %arg3[%c89, %c0_19] : memref<96x256xf32, #tpu.memory_space<vmem>>, vector<1x256xf32>
    %c0_20 = arith.constant 0 : index
    %c0_21 = arith.constant 0 : index
    %19 = vector.load %arg5[%c0_20, %c0_21] : memref<8x384xf32, #tpu.memory_space<vmem>>, vector<8x256xf32>
    %20 = vector.broadcast %17 : vector<1x256xf32> to vector<8x256xf32>
    %21 = arith.mulf %19, %20 : vector<8x256xf32>
    %c0_22 = arith.constant 0 : index
    %c1 = arith.constant 1 : index
    %22 = vector.load %arg5[%c0_22, %c1] : memref<8x384xf32, #tpu.memory_space<vmem>>, vector<8x256xf32>
    %c0_23 = arith.constant 0 : index
    %c2 = arith.constant 2 : index
    %23 = vector.load %arg5[%c0_23, %c2] : memref<8x384xf32, #tpu.memory_space<vmem>>, vector<8x256xf32>
    %24 = vector.broadcast %18 : vector<1x256xf32> to vector<8x256xf32>
    %25 = arith.mulf %23, %24 : vector<8x256xf32>
    %c0_24 = arith.constant 0 : index
    %c16 = arith.constant 16 : index
    %26 = vector.load %arg5[%c0_24, %c16] : memref<8x384xf32, #tpu.memory_space<vmem>>, vector<8x256xf32>
    %27 = vector.broadcast %17 : vector<1x256xf32> to vector<8x256xf32>
    %28 = arith.mulf %26, %27 : vector<8x256xf32>
    %c0_25 = arith.constant 0 : index
    %c17_26 = arith.constant 17 : index
    %29 = vector.load %arg5[%c0_25, %c17_26] : memref<8x384xf32, #tpu.memory_space<vmem>>, vector<8x256xf32>
    %c0_27 = arith.constant 0 : index
    %c18 = arith.constant 18 : index
    %30 = vector.load %arg5[%c0_27, %c18] : memref<8x384xf32, #tpu.memory_space<vmem>>, vector<8x256xf32>
    %31 = vector.broadcast %18 : vector<1x256xf32> to vector<8x256xf32>
    %32 = arith.mulf %30, %31 : vector<8x256xf32>
    %c0_28 = arith.constant 0 : index
    %c32 = arith.constant 32 : index
    %33 = vector.load %arg5[%c0_28, %c32] : memref<8x384xf32, #tpu.memory_space<vmem>>, vector<8x256xf32>
    %34 = vector.broadcast %17 : vector<1x256xf32> to vector<8x256xf32>
    %35 = arith.mulf %33, %34 : vector<8x256xf32>
    %c0_29 = arith.constant 0 : index
    %c33 = arith.constant 33 : index
    %36 = vector.load %arg5[%c0_29, %c33] : memref<8x384xf32, #tpu.memory_space<vmem>>, vector<8x256xf32>
    %c0_30 = arith.constant 0 : index
    %c34 = arith.constant 34 : index
    %37 = vector.load %arg5[%c0_30, %c34] : memref<8x384xf32, #tpu.memory_space<vmem>>, vector<8x256xf32>
    %38 = vector.broadcast %18 : vector<1x256xf32> to vector<8x256xf32>
    %39 = arith.mulf %37, %38 : vector<8x256xf32>
    %c80 = arith.constant 80 : index
    %c0_31 = arith.constant 0 : index
    %40 = vector.load %arg3[%c80, %c0_31] : memref<96x256xf32, #tpu.memory_space<vmem>>, vector<8x256xf32>
    %41 = tpu.concatenate %21, %22, %25, %28, %29, %32, %35, %36, %39, %40 in 0 : vector<8x256xf32>, vector<8x256xf32>, vector<8x256xf32>, vector<8x256xf32>, vector<8x256xf32>, vector<8x256xf32>, vector<8x256xf32>, vector<8x256xf32>, vector<8x256xf32>, vector<8x256xf32> -> vector<80x256xf32>
    %cst_32 = arith.constant dense<0.000000e+00> : vector<8x256xf32>
    %42 = tpu.matmul %15, %41, %cst_32 {dimension_numbers = #tpu.dot_dimension_numbers<[1], [0], [0], [1], [0, 0, 1, 1], [], []>} : vector<8x80xf32>, vector<80x256xf32>, vector<8x256xf32> -> vector<8x256xf32>
    %cst_33 = arith.constant dense<0.000000e+00> : vector<8x8xf32>
    %43 = tpu.matmul %42, %42, %cst_33 {dimension_numbers = #tpu.dot_dimension_numbers<[1], [1], [0], [0], [0, 0, 1, 0], [], []>} : vector<8x256xf32>, vector<8x256xf32>, vector<8x8xf32> -> vector<8x8xf32>
    %cst_34 = arith.constant 4.8828125E-4 : f32
    %44 = vector.broadcast %cst_34 : f32 to vector<8x8xf32>
    %45 = arith.mulf %43, %44 : vector<8x8xf32>
    %c0_35 = arith.constant 0 : index
    %c16_36 = arith.constant 16 : index
    %c0_37 = arith.constant 0 : index
    %46 = vector.load %arg4[%c0_35, %c16_36, %c0_37] : memref<1x96x128xf32, #tpu.memory_space<vmem>>, vector<1x8x8xf32>
    %47 = vector.shape_cast %46 : vector<1x8x8xf32> to vector<8x8xf32>
    %48 = vector.shape_cast %45 : vector<8x8xf32> to vector<1x8x8xf32>
    tpu.vector_store %arg4[%c0_35, %c16_36, %c0_37], %48 {strides = array<i32>} : memref<1x96x128xf32, #tpu.memory_space<vmem>>, vector<1x8x8xf32>,
    %cst_38 = arith.constant 0.000000e+00 : f32
    %49 = vector.broadcast %cst_38 : f32 to vector<8x256xf32>
    %50 = arith.maximumf %42, %49 : vector<8x256xf32>
    %c8 = arith.constant 8 : index
    %c0_39 = arith.constant 0 : index
    %51 = vector.load %arg2[%c8, %c0_39] : memref<80x256xf32, #tpu.memory_space<vmem>>, vector<8x80xf32>
    %c0_40 = arith.constant 0 : index
    %c17_41 = arith.constant 17 : index
    %52 = vector.load %arg5[%c0_40, %c17_41] : memref<8x384xf32, #tpu.memory_space<vmem>>, vector<8x256xf32>
    tpu.vector_store %arg5[%c0_40, %c17_41], %50 {strides = array<i32>} : memref<8x384xf32, #tpu.memory_space<vmem>>, vector<8x256xf32>,
    %c88_42 = arith.constant 88 : index
    %c0_43 = arith.constant 0 : index
    %53 = vector.load %arg3[%c88_42, %c0_43] : memref<96x256xf32, #tpu.memory_space<vmem>>, vector<1x256xf32>
    %c89_44 = arith.constant 89 : index
    %c0_45 = arith.constant 0 : index
    %54 = vector.load %arg3[%c89_44, %c0_45] : memref<96x256xf32, #tpu.memory_space<vmem>>, vector<1x256xf32>
    %c0_46 = arith.constant 0 : index
    %c0_47 = arith.constant 0 : index
    %55 = vector.load %arg5[%c0_46, %c0_47] : memref<8x384xf32, #tpu.memory_space<vmem>>, vector<8x256xf32>
    %56 = vector.broadcast %53 : vector<1x256xf32> to vector<8x256xf32>
    %57 = arith.mulf %55, %56 : vector<8x256xf32>
    %c0_48 = arith.constant 0 : index
    %c1_49 = arith.constant 1 : index
    %58 = vector.load %arg5[%c0_48, %c1_49] : memref<8x384xf32, #tpu.memory_space<vmem>>, vector<8x256xf32>
    %c0_50 = arith.constant 0 : index
    %c2_51 = arith.constant 2 : index
    %59 = vector.load %arg5[%c0_50, %c2_51] : memref<8x384xf32, #tpu.memory_space<vmem>>, vector<8x256xf32>
    %60 = vector.broadcast %54 : vector<1x256xf32> to vector<8x256xf32>
    %61 = arith.mulf %59, %60 : vector<8x256xf32>
    %c0_52 = arith.constant 0 : index
    %c16_53 = arith.constant 16 : index
    %62 = vector.load %arg5[%c0_52, %c16_53] : memref<8x384xf32, #tpu.memory_space<vmem>>, vector<8x256xf32>
    %63 = vector.broadcast %53 : vector<1x256xf32> to vector<8x256xf32>
    %64 = arith.mulf %62, %63 : vector<8x256xf32>
    %c0_54 = arith.constant 0 : index
    %c17_55 = arith.constant 17 : index
    %65 = vector.load %arg5[%c0_54, %c17_55] : memref<8x384xf32, #tpu.memory_space<vmem>>, vector<8x256xf32>
    %c0_56 = arith.constant 0 : index
    %c18_57 = arith.constant 18 : index
    %66 = vector.load %arg5[%c0_56, %c18_57] : memref<8x384xf32, #tpu.memory_space<vmem>>, vector<8x256xf32>
    %67 = vector.broadcast %54 : vector<1x256xf32> to vector<8x256xf32>
    %68 = arith.mulf %66, %67 : vector<8x256xf32>
    %c0_58 = arith.constant 0 : index
    %c32_59 = arith.constant 32 : index
    %69 = vector.load %arg5[%c0_58, %c32_59] : memref<8x384xf32, #tpu.memory_space<vmem>>, vector<8x256xf32>
    %70 = vector.broadcast %53 : vector<1x256xf32> to vector<8x256xf32>
    %71 = arith.mulf %69, %70 : vector<8x256xf32>
    %c0_60 = arith.constant 0 : index
    %c33_61 = arith.constant 33 : index
    %72 = vector.load %arg5[%c0_60, %c33_61] : memref<8x384xf32, #tpu.memory_space<vmem>>, vector<8x256xf32>
    %c0_62 = arith.constant 0 : index
    %c34_63 = arith.constant 34 : index
    %73 = vector.load %arg5[%c0_62, %c34_63] : memref<8x384xf32, #tpu.memory_space<vmem>>, vector<8x256xf32>
    %74 = vector.broadcast %54 : vector<1x256xf32> to vector<8x256xf32>
    %75 = arith.mulf %73, %74 : vector<8x256xf32>
    %c80_64 = arith.constant 80 : index
    %c0_65 = arith.constant 0 : index
    %76 = vector.load %arg3[%c80_64, %c0_65] : memref<96x256xf32, #tpu.memory_space<vmem>>, vector<8x256xf32>
    %77 = tpu.concatenate %57, %58, %61, %64, %65, %68, %71, %72, %75, %76 in 0 : vector<8x256xf32>, vector<8x256xf32>, vector<8x256xf32>, vector<8x256xf32>, vector<8x256xf32>, vector<8x256xf32>, vector<8x256xf32>, vector<8x256xf32>, vector<8x256xf32>, vector<8x256xf32> -> vector<80x256xf32>
    %cst_66 = arith.constant dense<0.000000e+00> : vector<8x256xf32>
    %78 = tpu.matmul %51, %77, %cst_66 {dimension_numbers = #tpu.dot_dimension_numbers<[1], [0], [0], [1], [0, 0, 1, 1], [], []>} : vector<8x80xf32>, vector<80x256xf32>, vector<8x256xf32> -> vector<8x256xf32>
    %cst_67 = arith.constant dense<0.000000e+00> : vector<8x8xf32>
    %79 = tpu.matmul %78, %78, %cst_67 {dimension_numbers = #tpu.dot_dimension_numbers<[1], [1], [0], [0], [0, 0, 1, 0], [], []>} : vector<8x256xf32>, vector<8x256xf32>, vector<8x8xf32> -> vector<8x8xf32>
    %cst_68 = arith.constant 4.8828125E-4 : f32
    %80 = vector.broadcast %cst_68 : f32 to vector<8x8xf32>
    %81 = arith.mulf %79, %80 : vector<8x8xf32>
    %c0_69 = arith.constant 0 : index
    %c24 = arith.constant 24 : index
    %c0_70 = arith.constant 0 : index
    %82 = vector.load %arg4[%c0_69, %c24, %c0_70] : memref<1x96x128xf32, #tpu.memory_space<vmem>>, vector<1x8x8xf32>
    %83 = vector.shape_cast %82 : vector<1x8x8xf32> to vector<8x8xf32>
    %84 = vector.shape_cast %81 : vector<8x8xf32> to vector<1x8x8xf32>
    tpu.vector_store %arg4[%c0_69, %c24, %c0_70], %84 {strides = array<i32>} : memref<1x96x128xf32, #tpu.memory_space<vmem>>, vector<1x8x8xf32>,
    %cst_71 = arith.constant 0.000000e+00 : f32
    %85 = vector.broadcast %cst_71 : f32 to vector<8x256xf32>
    %86 = arith.maximumf %78, %85 : vector<8x256xf32>
    %c0_72 = arith.constant 0 : index
    %c17_73 = arith.constant 17 : index
    %87 = vector.load %arg5[%c0_72, %c17_73] : memref<8x384xf32, #tpu.memory_space<vmem>>, vector<8x256xf32>
    tpu.vector_store %arg5[%c0_72, %c17_73], %86 {strides = array<i32>} : memref<8x384xf32, #tpu.memory_space<vmem>>, vector<8x256xf32>,
    %c0_74 = arith.constant 0 : index
    %c17_75 = arith.constant 17 : index
    %88 = vector.load %arg5[%c0_74, %c17_75] : memref<8x384xf32, #tpu.memory_space<vmem>>, vector<8x256xf32>
    %c0_76 = arith.constant 0 : index
    %c18_77 = arith.constant 18 : index
    %89 = vector.load %arg5[%c0_76, %c18_77] : memref<8x384xf32, #tpu.memory_space<vmem>>, vector<8x256xf32>
    %90 = arith.maximumf %88, %89 : vector<8x256xf32>
    %c0_78 = arith.constant 0 : index
    %c33_79 = arith.constant 33 : index
    %91 = vector.load %arg5[%c0_78, %c33_79] : memref<8x384xf32, #tpu.memory_space<vmem>>, vector<8x256xf32>
    %c0_80 = arith.constant 0 : index
    %c34_81 = arith.constant 34 : index
    %92 = vector.load %arg5[%c0_80, %c34_81] : memref<8x384xf32, #tpu.memory_space<vmem>>, vector<8x256xf32>
    %93 = arith.maximumf %91, %92 : vector<8x256xf32>
    %94 = arith.maximumf %90, %93 : vector<8x256xf32>
    %c0_82 = arith.constant 0 : index
    %c0_83 = arith.constant 0 : index
    %95 = vector.load %arg3[%c0_82, %c0_83] : memref<96x256xf32, #tpu.memory_space<vmem>>, vector<64x256xf32>
    %cst_84 = arith.constant dense<0.000000e+00> : vector<8x64xf32>
    %96 = tpu.matmul %94, %95, %cst_84 {dimension_numbers = #tpu.dot_dimension_numbers<[1], [1], [0], [0], [0, 0, 1, 0], [], []>} : vector<8x256xf32>, vector<64x256xf32>, vector<8x64xf32> -> vector<8x64xf32>
    %c16_85 = arith.constant 16 : index
    %c0_86 = arith.constant 0 : index
    %97 = vector.load %arg2[%c16_85, %c0_86] : memref<80x256xf32, #tpu.memory_space<vmem>>, vector<16x80xf32>
    %c0_87 = arith.constant 0 : index
    %c9 = arith.constant 9 : index
    %98 = vector.load %arg6[%c0_87, %c9] : memref<16x128xf32, #tpu.memory_space<vmem>>, vector<8x64xf32>
    tpu.vector_store %arg6[%c0_87, %c9], %96 {strides = array<i32>} : memref<16x128xf32, #tpu.memory_space<vmem>>, vector<8x64xf32>,
    %c90 = arith.constant 90 : index
    %c0_88 = arith.constant 0 : index
    %99 = vector.load %arg3[%c90, %c0_88] : memref<96x256xf32, #tpu.memory_space<vmem>>, vector<1x64xf32>
    %c91 = arith.constant 91 : index
    %c0_89 = arith.constant 0 : index
    %100 = vector.load %arg3[%c91, %c0_89] : memref<96x256xf32, #tpu.memory_space<vmem>>, vector<1x64xf32>
    %c0_90 = arith.constant 0 : index
    %c0_91 = arith.constant 0 : index
    %101 = vector.load %arg6[%c0_90, %c0_91] : memref<16x128xf32, #tpu.memory_space<vmem>>, vector<8x64xf32>
    %102 = vector.broadcast %99 : vector<1x64xf32> to vector<8x64xf32>
    %103 = arith.mulf %101, %102 : vector<8x64xf32>
    %c0_92 = arith.constant 0 : index
    %c1_93 = arith.constant 1 : index
    %104 = vector.load %arg6[%c0_92, %c1_93] : memref<16x128xf32, #tpu.memory_space<vmem>>, vector<8x64xf32>
    %c0_94 = arith.constant 0 : index
    %c2_95 = arith.constant 2 : index
    %105 = vector.load %arg6[%c0_94, %c2_95] : memref<16x128xf32, #tpu.memory_space<vmem>>, vector<8x64xf32>
    %106 = vector.broadcast %100 : vector<1x64xf32> to vector<8x64xf32>
    %107 = arith.mulf %105, %106 : vector<8x64xf32>
    %c0_96 = arith.constant 0 : index
    %c8_97 = arith.constant 8 : index
    %108 = vector.load %arg6[%c0_96, %c8_97] : memref<16x128xf32, #tpu.memory_space<vmem>>, vector<8x64xf32>
    %109 = vector.broadcast %99 : vector<1x64xf32> to vector<8x64xf32>
    %110 = arith.mulf %108, %109 : vector<8x64xf32>
    %c0_98 = arith.constant 0 : index
    %c9_99 = arith.constant 9 : index
    %111 = vector.load %arg6[%c0_98, %c9_99] : memref<16x128xf32, #tpu.memory_space<vmem>>, vector<8x64xf32>
    %c0_100 = arith.constant 0 : index
    %c10 = arith.constant 10 : index
    %112 = vector.load %arg6[%c0_100, %c10] : memref<16x128xf32, #tpu.memory_space<vmem>>, vector<8x64xf32>
    %113 = vector.broadcast %100 : vector<1x64xf32> to vector<8x64xf32>
    %114 = arith.mulf %112, %113 : vector<8x64xf32>
    %c0_101 = arith.constant 0 : index
    %c16_102 = arith.constant 16 : index
    %115 = vector.load %arg6[%c0_101, %c16_102] : memref<16x128xf32, #tpu.memory_space<vmem>>, vector<8x64xf32>
    %116 = vector.broadcast %99 : vector<1x64xf32> to vector<8x64xf32>
    %117 = arith.mulf %115, %116 : vector<8x64xf32>
    %c0_103 = arith.constant 0 : index
    %c17_104 = arith.constant 17 : index
    %118 = vector.load %arg6[%c0_103, %c17_104] : memref<16x128xf32, #tpu.memory_space<vmem>>, vector<8x64xf32>
    %c0_105 = arith.constant 0 : index
    %c18_106 = arith.constant 18 : index
    %119 = vector.load %arg6[%c0_105, %c18_106] : memref<16x128xf32, #tpu.memory_space<vmem>>, vector<8x64xf32>
    %120 = vector.broadcast %100 : vector<1x64xf32> to vector<8x64xf32>
    %121 = arith.mulf %119, %120 : vector<8x64xf32>
    %c80_107 = arith.constant 80 : index
    %c0_108 = arith.constant 0 : index
    %122 = vector.load %arg3[%c80_107, %c0_108] : memref<96x256xf32, #tpu.memory_space<vmem>>, vector<8x64xf32>
    %123 = tpu.concatenate %103, %104, %107, %110, %111, %114, %117, %118, %121, %122 in 0 : vector<8x64xf32>, vector<8x64xf32>, vector<8x64xf32>, vector<8x64xf32>, vector<8x64xf32>, vector<8x64xf32>, vector<8x64xf32>, vector<8x64xf32>, vector<8x64xf32>, vector<8x64xf32> -> vector<80x64xf32>
    %cst_109 = arith.constant dense<0.000000e+00> : vector<16x64xf32>
    %124 = tpu.matmul %97, %123, %cst_109 {dimension_numbers = #tpu.dot_dimension_numbers<[1], [0], [0], [1], [0, 0, 1, 1], [], []>} : vector<16x80xf32>, vector<80x64xf32>, vector<16x64xf32> -> vector<16x64xf32>
    %cst_110 = arith.constant dense<0.000000e+00> : vector<16x16xf32>
    %125 = tpu.matmul %124, %124, %cst_110 {dimension_numbers = #tpu.dot_dimension_numbers<[1], [1], [0], [0], [0, 0, 1, 0], [], []>} : vector<16x64xf32>, vector<16x64xf32>, vector<16x16xf32> -> vector<16x16xf32>
    %cst_111 = arith.constant 9.765625E-4 : f32
    %126 = vector.broadcast %cst_111 : f32 to vector<16x16xf32>
    %127 = arith.mulf %125, %126 : vector<16x16xf32>
    %c0_112 = arith.constant 0 : index
    %c32_113 = arith.constant 32 : index
    %c0_114 = arith.constant 0 : index
    %128 = vector.load %arg4[%c0_112, %c32_113, %c0_114] : memref<1x96x128xf32, #tpu.memory_space<vmem>>, vector<1x16x16xf32>
    %129 = vector.shape_cast %128 : vector<1x16x16xf32> to vector<16x16xf32>
    %130 = vector.shape_cast %127 : vector<16x16xf32> to vector<1x16x16xf32>
    tpu.vector_store %arg4[%c0_112, %c32_113, %c0_114], %130 {strides = array<i32>} : memref<1x96x128xf32, #tpu.memory_space<vmem>>, vector<1x16x16xf32>,
    %cst_115 = arith.constant 0.000000e+00 : f32
    %131 = vector.broadcast %cst_115 : f32 to vector<16x64xf32>
    %132 = arith.maximumf %124, %131 : vector<16x64xf32>
    %c32_116 = arith.constant 32 : index
    %c0_117 = arith.constant 0 : index
    %133 = vector.load %arg2[%c32_116, %c0_117] : memref<80x256xf32, #tpu.memory_space<vmem>>, vector<16x152xf32>
    %c0_118 = arith.constant 0 : index
    %c9_119 = arith.constant 9 : index
    %134 = vector.load %arg6[%c0_118, %c9_119] : memref<16x128xf32, #tpu.memory_space<vmem>>, vector<16x64xf32>
    tpu.vector_store %arg6[%c0_118, %c9_119], %132 {strides = array<i32>} : memref<16x128xf32, #tpu.memory_space<vmem>>, vector<16x64xf32>,
    %c90_120 = arith.constant 90 : index
    %c0_121 = arith.constant 0 : index
    %135 = vector.load %arg3[%c90_120, %c0_121] : memref<96x256xf32, #tpu.memory_space<vmem>>, vector<1x64xf32>
    %c91_122 = arith.constant 91 : index
    %c0_123 = arith.constant 0 : index
    %136 = vector.load %arg3[%c91_122, %c0_123] : memref<96x256xf32, #tpu.memory_space<vmem>>, vector<1x64xf32>
    %c0_124 = arith.constant 0 : index
    %c0_125 = arith.constant 0 : index
    %137 = vector.load %arg6[%c0_124, %c0_125] : memref<16x128xf32, #tpu.memory_space<vmem>>, vector<16x64xf32>
    %138 = vector.broadcast %135 : vector<1x64xf32> to vector<16x64xf32>
    %139 = arith.mulf %137, %138 : vector<16x64xf32>
    %c0_126 = arith.constant 0 : index
    %c1_127 = arith.constant 1 : index
    %140 = vector.load %arg6[%c0_126, %c1_127] : memref<16x128xf32, #tpu.memory_space<vmem>>, vector<16x64xf32>
    %c0_128 = arith.constant 0 : index
    %c2_129 = arith.constant 2 : index
    %141 = vector.load %arg6[%c0_128, %c2_129] : memref<16x128xf32, #tpu.memory_space<vmem>>, vector<16x64xf32>
    %142 = vector.broadcast %136 : vector<1x64xf32> to vector<16x64xf32>
    %143 = arith.mulf %141, %142 : vector<16x64xf32>
    %c0_130 = arith.constant 0 : index
    %c8_131 = arith.constant 8 : index
    %144 = vector.load %arg6[%c0_130, %c8_131] : memref<16x128xf32, #tpu.memory_space<vmem>>, vector<16x64xf32>
    %145 = vector.broadcast %135 : vector<1x64xf32> to vector<16x64xf32>
    %146 = arith.mulf %144, %145 : vector<16x64xf32>
    %c0_132 = arith.constant 0 : index
    %c9_133 = arith.constant 9 : index
    %147 = vector.load %arg6[%c0_132, %c9_133] : memref<16x128xf32, #tpu.memory_space<vmem>>, vector<16x64xf32>
    %c0_134 = arith.constant 0 : index
    %c10_135 = arith.constant 10 : index
    %148 = vector.load %arg6[%c0_134, %c10_135] : memref<16x128xf32, #tpu.memory_space<vmem>>, vector<16x64xf32>
    %149 = vector.broadcast %136 : vector<1x64xf32> to vector<16x64xf32>
    %150 = arith.mulf %148, %149 : vector<16x64xf32>
    %c0_136 = arith.constant 0 : index
    %c16_137 = arith.constant 16 : index
    %151 = vector.load %arg6[%c0_136, %c16_137] : memref<16x128xf32, #tpu.memory_space<vmem>>, vector<16x64xf32>
    %152 = vector.broadcast %135 : vector<1x64xf32> to vector<16x64xf32>
    %153 = arith.mulf %151, %152 : vector<16x64xf32>
    %c0_138 = arith.constant 0 : index
    %c17_139 = arith.constant 17 : index
    %154 = vector.load %arg6[%c0_138, %c17_139] : memref<16x128xf32, #tpu.memory_space<vmem>>, vector<16x64xf32>
    %c0_140 = arith.constant 0 : index
    %c18_141 = arith.constant 18 : index
    %155 = vector.load %arg6[%c0_140, %c18_141] : memref<16x128xf32, #tpu.memory_space<vmem>>, vector<16x64xf32>
    %156 = vector.broadcast %136 : vector<1x64xf32> to vector<16x64xf32>
    %157 = arith.mulf %155, %156 : vector<16x64xf32>
    %c80_142 = arith.constant 80 : index
    %c0_143 = arith.constant 0 : index
    %158 = vector.load %arg3[%c80_142, %c0_143] : memref<96x256xf32, #tpu.memory_space<vmem>>, vector<8x64xf32>
    %159 = tpu.concatenate %139, %140, %143, %146, %147, %150, %153, %154, %157, %158 in 0 : vector<16x64xf32>, vector<16x64xf32>, vector<16x64xf32>, vector<16x64xf32>, vector<16x64xf32>, vector<16x64xf32>, vector<16x64xf32>, vector<16x64xf32>, vector<16x64xf32>, vector<8x64xf32> -> vector<152x64xf32>
    %cst_144 = arith.constant dense<0.000000e+00> : vector<16x64xf32>
    %160 = tpu.matmul %133, %159, %cst_144 {dimension_numbers = #tpu.dot_dimension_numbers<[1], [0], [0], [1], [0, 0, 1, 1], [], []>} : vector<16x152xf32>, vector<152x64xf32>, vector<16x64xf32> -> vector<16x64xf32>
    %cst_145 = arith.constant dense<0.000000e+00> : vector<16x16xf32>
    %161 = tpu.matmul %160, %160, %cst_145 {dimension_numbers = #tpu.dot_dimension_numbers<[1], [1], [0], [0], [0, 0, 1, 0], [], []>} : vector<16x64xf32>, vector<16x64xf32>, vector<16x16xf32> -> vector<16x16xf32>
    %cst_146 = arith.constant 9.765625E-4 : f32
    %162 = vector.broadcast %cst_146 : f32 to vector<16x16xf32>
    %163 = arith.mulf %161, %162 : vector<16x16xf32>
    %c0_147 = arith.constant 0 : index
    %c48 = arith.constant 48 : index
    %c0_148 = arith.constant 0 : index
    %164 = vector.load %arg4[%c0_147, %c48, %c0_148] : memref<1x96x128xf32, #tpu.memory_space<vmem>>, vector<1x16x16xf32>
    %165 = vector.shape_cast %164 : vector<1x16x16xf32> to vector<16x16xf32>
    %166 = vector.shape_cast %163 : vector<16x16xf32> to vector<1x16x16xf32>
    tpu.vector_store %arg4[%c0_147, %c48, %c0_148], %166 {strides = array<i32>} : memref<1x96x128xf32, #tpu.memory_space<vmem>>, vector<1x16x16xf32>,
    %c0_149 = arith.constant 0 : index
    %c0_150 = arith.constant 0 : index
    %c0_151 = arith.constant 0 : index
    %167 = vector.load %arg4[%c0_149, %c0_150, %c0_151] : memref<1x96x128xf32, #tpu.memory_space<vmem>>, vector<1x16x64xf32>
    %168 = vector.shape_cast %167 : vector<1x16x64xf32> to vector<16x64xf32>
    %169 = vector.shape_cast %160 : vector<16x64xf32> to vector<1x16x64xf32>
    tpu.vector_store %arg4[%c0_149, %c0_150, %c0_151], %169 {strides = array<i32>} : memref<1x96x128xf32, #tpu.memory_space<vmem>>, vector<1x16x64xf32>,
    %cst_152 = arith.constant 0.000000e+00 : f32
    %170 = vector.broadcast %cst_152 : f32 to vector<16x64xf32>
    %171 = arith.maximumf %160, %170 : vector<16x64xf32>
    %c0_153 = arith.constant 0 : index
    %c9_154 = arith.constant 9 : index
    %172 = vector.load %arg6[%c0_153, %c9_154] : memref<16x128xf32, #tpu.memory_space<vmem>>, vector<16x64xf32>
    tpu.vector_store %arg6[%c0_153, %c9_154], %171 {strides = array<i32>} : memref<16x128xf32, #tpu.memory_space<vmem>>, vector<16x64xf32>,
    %c0_155 = arith.constant 0 : index
    %c9_156 = arith.constant 9 : index
    %173 = vector.load %arg6[%c0_155, %c9_156] : memref<16x128xf32, #tpu.memory_space<vmem>>, vector<16x64xf32>
    %c0_157 = arith.constant 0 : index
    %c10_158 = arith.constant 10 : index
    %174 = vector.load %arg6[%c0_157, %c10_158] : memref<16x128xf32, #tpu.memory_space<vmem>>, vector<16x64xf32>
    %175 = arith.maximumf %173, %174 : vector<16x64xf32>
    %c0_159 = arith.constant 0 : index
    %c17_160 = arith.constant 17 : index
    %176 = vector.load %arg6[%c0_159, %c17_160] : memref<16x128xf32, #tpu.memory_space<vmem>>, vector<16x64xf32>
    %c0_161 = arith.constant 0 : index
    %c18_162 = arith.constant 18 : index
    %177 = vector.load %arg6[%c0_161, %c18_162] : memref<16x128xf32, #tpu.memory_space<vmem>>, vector<16x64xf32>
    %178 = arith.maximumf %176, %177 : vector<16x64xf32>
    %179 = arith.maximumf %175, %178 : vector<16x64xf32>
    %c64_163 = arith.constant 64 : index
    %c0_164 = arith.constant 0 : index
    %180 = vector.load %arg3[%c64_163, %c0_164] : memref<96x256xf32, #tpu.memory_space<vmem>>, vector<16x64xf32>
    %cst_165 = arith.constant dense<0.000000e+00> : vector<16x16xf32>
    %181 = tpu.matmul %179, %180, %cst_165 {dimension_numbers = #tpu.dot_dimension_numbers<[1], [1], [0], [0], [0, 0, 1, 0], [], []>} : vector<16x64xf32>, vector<16x64xf32>, vector<16x16xf32> -> vector<16x16xf32>
    %c48_166 = arith.constant 48 : index
    %c0_167 = arith.constant 0 : index
    %182 = vector.load %arg2[%c48_166, %c0_167] : memref<80x256xf32, #tpu.memory_space<vmem>>, vector<32x152xf32>
    %c0_168 = arith.constant 0 : index
    %c5 = arith.constant 5 : index
    %183 = vector.load %arg7[%c0_168, %c5] : memref<16x128xf32, #tpu.memory_space<vmem>>, vector<16x16xf32>
    tpu.vector_store %arg7[%c0_168, %c5], %181 {strides = array<i32>} : memref<16x128xf32, #tpu.memory_space<vmem>>, vector<16x16xf32>,
    %c92 = arith.constant 92 : index
    %c0_169 = arith.constant 0 : index
    %184 = vector.load %arg3[%c92, %c0_169] : memref<96x256xf32, #tpu.memory_space<vmem>>, vector<1x16xf32>
    %c93 = arith.constant 93 : index
    %c0_170 = arith.constant 0 : index
    %185 = vector.load %arg3[%c93, %c0_170] : memref<96x256xf32, #tpu.memory_space<vmem>>, vector<1x16xf32>
    %c0_171 = arith.constant 0 : index
    %c0_172 = arith.constant 0 : index
    %186 = vector.load %arg7[%c0_171, %c0_172] : memref<16x128xf32, #tpu.memory_space<vmem>>, vector<16x16xf32>
    %187 = vector.broadcast %184 : vector<1x16xf32> to vector<16x16xf32>
    %188 = arith.mulf %186, %187 : vector<16x16xf32>
    %c0_173 = arith.constant 0 : index
    %c1_174 = arith.constant 1 : index
    %189 = vector.load %arg7[%c0_173, %c1_174] : memref<16x128xf32, #tpu.memory_space<vmem>>, vector<16x16xf32>
    %c0_175 = arith.constant 0 : index
    %c2_176 = arith.constant 2 : index
    %190 = vector.load %arg7[%c0_175, %c2_176] : memref<16x128xf32, #tpu.memory_space<vmem>>, vector<16x16xf32>
    %191 = vector.broadcast %185 : vector<1x16xf32> to vector<16x16xf32>
    %192 = arith.mulf %190, %191 : vector<16x16xf32>
    %c0_177 = arith.constant 0 : index
    %c4 = arith.constant 4 : index
    %193 = vector.load %arg7[%c0_177, %c4] : memref<16x128xf32, #tpu.memory_space<vmem>>, vector<16x16xf32>
    %194 = vector.broadcast %184 : vector<1x16xf32> to vector<16x16xf32>
    %195 = arith.mulf %193, %194 : vector<16x16xf32>
    %c0_178 = arith.constant 0 : index
    %c5_179 = arith.constant 5 : index
    %196 = vector.load %arg7[%c0_178, %c5_179] : memref<16x128xf32, #tpu.memory_space<vmem>>, vector<16x16xf32>
    %c0_180 = arith.constant 0 : index
    %c6 = arith.constant 6 : index
    %197 = vector.load %arg7[%c0_180, %c6] : memref<16x128xf32, #tpu.memory_space<vmem>>, vector<16x16xf32>
    %198 = vector.broadcast %185 : vector<1x16xf32> to vector<16x16xf32>
    %199 = arith.mulf %197, %198 : vector<16x16xf32>
    %c0_181 = arith.constant 0 : index
    %c8_182 = arith.constant 8 : index
    %200 = vector.load %arg7[%c0_181, %c8_182] : memref<16x128xf32, #tpu.memory_space<vmem>>, vector<16x16xf32>
    %201 = vector.broadcast %184 : vector<1x16xf32> to vector<16x16xf32>
    %202 = arith.mulf %200, %201 : vector<16x16xf32>
    %c0_183 = arith.constant 0 : index
    %c9_184 = arith.constant 9 : index
    %203 = vector.load %arg7[%c0_183, %c9_184] : memref<16x128xf32, #tpu.memory_space<vmem>>, vector<16x16xf32>
    %c0_185 = arith.constant 0 : index
    %c10_186 = arith.constant 10 : index
    %204 = vector.load %arg7[%c0_185, %c10_186] : memref<16x128xf32, #tpu.memory_space<vmem>>, vector<16x16xf32>
    %205 = vector.broadcast %185 : vector<1x16xf32> to vector<16x16xf32>
    %206 = arith.mulf %204, %205 : vector<16x16xf32>
    %c80_187 = arith.constant 80 : index
    %c0_188 = arith.constant 0 : index
    %207 = vector.load %arg3[%c80_187, %c0_188] : memref<96x256xf32, #tpu.memory_space<vmem>>, vector<8x16xf32>
    %208 = tpu.concatenate %188, %189, %192, %195, %196, %199, %202, %203, %206, %207 in 0 : vector<16x16xf32>, vector<16x16xf32>, vector<16x16xf32>, vector<16x16xf32>, vector<16x16xf32>, vector<16x16xf32>, vector<16x16xf32>, vector<16x16xf32>, vector<16x16xf32>, vector<8x16xf32> -> vector<152x16xf32>
    %cst_189 = arith.constant dense<0.000000e+00> : vector<32x16xf32>
    %209 = tpu.matmul %182, %208, %cst_189 {dimension_numbers = #tpu.dot_dimension_numbers<[1], [0], [0], [1], [0, 0, 1, 1], [], []>} : vector<32x152xf32>, vector<152x16xf32>, vector<32x16xf32> -> vector<32x16xf32>
    %cst_190 = arith.constant dense<0.000000e+00> : vector<32x32xf32>
    %210 = tpu.matmul %209, %209, %cst_190 {dimension_numbers = #tpu.dot_dimension_numbers<[1], [1], [0], [0], [0, 0, 1, 0], [], []>} : vector<32x16xf32>, vector<32x16xf32>, vector<32x32xf32> -> vector<32x32xf32>
    %cst_191 = arith.constant 0.001953125 : f32
    %211 = vector.broadcast %cst_191 : f32 to vector<32x32xf32>
    %212 = arith.mulf %210, %211 : vector<32x32xf32>
    %c0_192 = arith.constant 0 : index
    %c64_193 = arith.constant 64 : index
    %c0_194 = arith.constant 0 : index
    %213 = vector.load %arg4[%c0_192, %c64_193, %c0_194] : memref<1x96x128xf32, #tpu.memory_space<vmem>>, vector<1x32x32xf32>
    %214 = vector.shape_cast %213 : vector<1x32x32xf32> to vector<32x32xf32>
    %215 = vector.shape_cast %212 : vector<32x32xf32> to vector<1x32x32xf32>
    tpu.vector_store %arg4[%c0_192, %c64_193, %c0_194], %215 {strides = array<i32>} : memref<1x96x128xf32, #tpu.memory_space<vmem>>, vector<1x32x32xf32>,
    return
  }
  func.func @transform_0(%arg0: i32) -> (i32, i32, i32) {
    %c0_i32 = arith.constant 0 : i32
    %c0_i32_0 = arith.constant 0 : i32
    %c0_i32_1 = arith.constant 0 : i32
    return %arg0, %c0_i32, %c0_i32_0 : i32, i32, i32
  }
  func.func @transform_1(%arg0: i32) -> (i32, i32) {
    %c0_i32 = arith.constant 0 : i32
    %c0_i32_0 = arith.constant 0 : i32
    %c0_i32_1 = arith.constant 0 : i32
    return %c0_i32, %c0_i32_0 : i32, i32
  }
  func.func @transform_2(%arg0: i32) -> (i32, i32) {
    %c0_i32 = arith.constant 0 : i32
    %c0_i32_0 = arith.constant 0 : i32
    %c0_i32_1 = arith.constant 0 : i32
    return %c0_i32, %c0_i32_0 : i32, i32
  }
  func.func @transform_3(%arg0: i32) -> (i32, i32, i32) {
    %c0_i32 = arith.constant 0 : i32
    %c0_i32_0 = arith.constant 0 : i32
    %c0_i32_1 = arith.constant 0 : i32
    return %arg0, %c0_i32, %c0_i32_0 : i32, i32, i32
  }
}

</mosaic_0001>

<bundles_post_ra>
// kernel: init_targets.1
= control target key start
LH: loop header
LB: loop body
LE: loop exit
PB: predicated region body
PF: predicated region fallthrough
CT: control target
= control target key end

     0   :  { %8 = vsyncpa [#allocation6], 0  ;;  %s2712_s12 = smov 0   ;;  %s3248_s0 = inlined_call_operand.vmem [shape: f32[2,8,256], index: 0, kind: input, shape index: {}]   ;;  %s3249_s1 = inlined_call_operand.hbm [shape: f32[80,256], index: 1, kind: input, shape index: {}]   ;;  %s3250_s2 = inlined_call_operand.vmem [shape: f32[96,256], index: 2, kind: input, shape index: {}]   ;;  %s3251_s3 = inlined_call_operand.vmem [shape: f32[2,96,128], index: 3, kind: output, shape index: {}]  }
   0x1 LB: > { %s2718_s13 = sadd.s32 4294967295, %s2658_s12   ;;  %p2097_p0 = scmp.ge.s32.totalorder %s2658_s12, 1  ;;  %s2658_s12 = sphi %s2712_s12, %s14_s12  }
   0x2   : > { %p113_p1 = scmp.lt.s32.totalorder %s2658_s12, 3  ;;  %s2660_s14 = smov [#allocation5]  }
   0x3   : > { %s125_s15 = sshll.u32 %s2660_s14, 4  ;;  %p3252_p3 = scmp.eq.s32.totalorder %s2718_s13, 0  ;;  %s126_s15 = int_to_ptr.vmem [resolvable:$true] %s125_s15 }
   0x4   : > { %p2722_p2 = pnand %p2097_p0, %p113_p1  ;;  %s2620_s20 = scalar_lea.hbm %s3249_s1, 2560 }
   0x5   : > { %p2621_p6 = scmp.ne.s32.totalorder %s3249_s1, %s2620_s20  ;;  %p2627_p10 = scmp.lt.u32.totalorder %s2620_s20, %s3249_s1 }
   0x6   : > { %s3254_s16 = scalar_select %p2722_p2, 1, 0 }
   0x7   : > { %p2397_p4 = pneg %p2722_p2 }
   0x9   : > { %p2731_p5 = pnand %p3252_p3, %p2397_p4 }
   0xb   : > { %p2622_p7 = pneg %p2731_p5 }
   0xd   : > { %p2623_p8 = pnand %p2622_p7, %p2621_p6 }
   0xf   : > { %p2624_p9 = pneg %p2623_p8 }
  0x11   : > { %p2629_p11 = pnand %p2627_p10, %p2624_p9 }
  0x13   : > { %2632 = shalt.err (!%p2629_p11)
}
  0x14   : > { %s2633_s25 = scalar_lea.vmem %s126_s15, 2560  ;;  %p2641_p1 = scmp.lt.s32.totalorder %s126_s15, %s126_s15 }
  0x15   : > { %p2634_p12 = scmp.ne.s32.totalorder %s126_s15, %s2633_s25  ;;  %p2642_p4 = scmp.lt.s32.totalorder %s2633_s25, %s2633_s25 }
  0x17   : > { %p2636_p13 = pnand %p2634_p12, %p2622_p7  ;;  %p2643_p3 = por %p2642_p4, %p2641_p1 }
  0x19   : > { %p2637_p0 = pneg %p2636_p13 }
  0x1b   : > { %p2644_p2 = pnand %p2643_p3, %p2637_p0 }
  0x1d   : > { %2647 = shalt.err (!%p2644_p2)
}
  0x1e   : > { %s2661_s26 = smov 256   ;;  %s2662_s27 = smov 16  }
  0x1f   : > { %2400 = dma.hbm_to_vmem [thread:$0]  (!%p2731_p5), %s3249_s1, 2560, %s126_s15, [#allocation6], %s2661_s26, %s2661_s26, %s2662_s27  }
  0x20   : > { %p3256_p6 = scmp.ne.s32.totalorder %s3254_s16, 0 }
  0x21   : > { %p3257_p8 = scmp.eq.s32.totalorder (!%p3256_p6), %s2718_s13, 0 }
  0x22   : > { %152 = sbr.rel (%p3256_p6) target bundleno = 4240 (0x1090), region = 32 }
  0x29   : > { %2653 = dma.done.wait (%p3257_p8), [#allocation6], 2560   ;;  %p3258_p7 = pmov %p3257_p8 }
  0x2a   : > { %v2663_v0 = vmov 64   ;;  %v207_v1 = vld [vmem:[%s3250_s2 + $0x80] sm:$0xff]  ;;  %p176_p2 = scmp.lt.s32.totalorder %s2718_s13, 1  ;;  %v2664_v2 = vmov 0.0   ;;  %v238_v3 = vlaneseq  ;;  %s2665_s17 = smov 17   ;;  %vm222_vm0 = vcmask 138240  }
  0x2b   : > { %2655 = vsyncadd (%p3258_p7), [#allocation6], 4294964736  ;;  %2443 = vset.pattern.permute.xlu0 %v2663_v0  ;;  %188 = vst [vmem:[#allocation2 + $0x10] sm:$0xff] %v2664_v2  ;;  %498 = vmatprep.mubr.f32.mxu0 %v2664_v2  ;;  %v2106_v10 = vld [vmem:[%s3250_s2 + $0xb1] ss:$8 sm:$0x3] }
  0x2c   : > { %210 = vperm.xlu0 %2443, %v207_v1   ;;  %s3262_s13 = smov (!%p176_p2, %s2718_s13), 1  ;;  %186 = vst [vmem:[#allocation2] sm:$0xff] %v2664_v2  ;;  %189 = vst [vmem:[#allocation3] sm:$0xff] %v2664_v2  ;;  %v239_v4 = vshrl.u32 %v238_v3, 7  ;;  %s2666_s19 = smov 2   ;;  %vm227_vm1 = vcmask 1047688  }
  0x2d   : > { %s2392_s5 = smul.u32 96, %s3262_s13  ;;  %190 = vst [vmem:[#allocation3 + $0x8] sm:$0xff] %v2664_v2  ;;  %191 = vst [vmem:[#allocation4] sm:$0xff] %v2664_v2  ;;  %s2141_s9 = sshll.u32 %s3262_s13, 4  ;;  %vm278_vm2 = vcmask 130048   ;;  %vm290_vm3 = vcmask 146432  }
  0x2e   : > { %192 = vst [vmem:[#allocation4 + $0x8] sm:$0xff] %v2664_v2  ;;  %s180_s14 = scalar_lea.vmem %s3248_s0, %s2141_s9  ;;  %v2801_v7 = vsub.s32 0, %v239_v4  ;;  %v2803_v8 = vsub.s32 1, %v239_v4  ;;  %v2105_v15 = vld [vmem:[%s3250_s2 + $0xb0] ss:$8 sm:$0x3] }
  0x2f   : > { %s2765_s8 = scalar_lea.vmem %s3251_s3, %s2392_s5  ;;  %v205_v5 = vld [vmem:[%s180_s14] sm:$0xff]  ;;  %v206_v6 = vld [vmem:[%s180_s14 + $0x8] sm:$0xff]  ;;  %s2667_s20 = smov 16   ;;  %vm266_vm4 = vcmask 15360   ;;  %vm302_vm5 = vcmask 261120   ;;  %vm314_vm6 = vcmask 277504  }
  0x30   : > { %193 = vst [vmem:[%s2765_s8] sm:$0xff] %v2664_v2  ;;  %194 = vst [vmem:[%s2765_s8 + $0x8] sm:$0xff] %v2664_v2  ;;  %v257_v13 = vrot.slane %v2106_v10, %v2801_v7  ;;  %v261_v14 = vrot.slane %v2106_v10, %v2803_v8  ;;  %v2818_v16 = vrot.slane %v2105_v15, %v2801_v7  ;;  %s2668_s21 = smov 18   ;;  %s2669_s22 = smov 32   ;;  %vm333_vm7 = vcmask 1039360  }
  0x31   : > { %195 = vst [vmem:[%s2765_s8 + $0x10] sm:$0xff] %v2664_v2  ;;  %196 = vst [vmem:[%s2765_s8 + $0x18] sm:$0xff] %v2664_v2  ;;  %v2821_v17 = vrot.slane %v2105_v15, %v2803_v8  ;;  %s2670_s23 = smov 34   ;;  %s2671_s24 = smov 111   ;;  %vm347_vm8 = vcmask 1031168   ;;  %vm361_vm9 = vcmask 916480  }
  0x32   : > { %197 = vst [vmem:[%s2765_s8 + $0x20] sm:$0xff] %v2664_v2  ;;  %198 = vst [vmem:[%s2765_s8 + $0x28] sm:$0xff] %v2664_v2  ;;  %s2672_s25 = smov 127   ;;  %s2673_s26 = smov 112   ;;  %vm386_vm10 = vcmask 900096   ;;  %vm372_vm11 = vcmask 908288  }
  0x33   : > { %199 = vst [vmem:[%s2765_s8 + $0x30] sm:$0xff] %v2664_v2  ;;  %200 = vst [vmem:[%s2765_s8 + $0x38] sm:$0xff] %v2664_v2  ;;  %s2674_s27 = smov 110   ;;  %s2675_s28 = smov 126   ;;  %vm411_vm12 = vcmask 777216   ;;  %vm400_vm13 = vcmask 785408  }
  0x34   : > { %201 = vst [vmem:[%s2765_s8 + $0x40] sm:$0xff] %v2664_v2  ;;  %202 = vst [vmem:[%s2765_s8 + $0x48] sm:$0xff] %v2664_v2  ;;  %s2676_s29 = smov 96   ;;  %s2677_s30 = smov 95   ;;  %vm425_vm14 = vcmask 769024   ;;  %vm430_vm15 = vcmask 654336  }
  0x35   : > { %203 = vst [vmem:[%s2765_s8 + $0x50] sm:$0xff] %v2664_v2  ;;  %204 = vst [vmem:[%s2765_s8 + $0x58] sm:$0xff] %v2664_v2  ;;  %s2678_s4 = smov 94   ;;  %s2679_s16 = smov 10  }
  0x36   : > { %s2687_s9 = smov 4   ;;  %s2688_s10 = smov 6  }
  0x37   : > { %s2690_s11 = smov 123  }
  0xab   : > { %v211_v9 = vpop.permute.xlu0 %210 }
  0xac   : > { %v213_v11 = vsub.f32 %v205_v5, %v211_v9  ;;  %v214_v12 = vsub.f32 %v206_v6, %v211_v9 }
  0xae   : > { %220 = vrot.lane.b32.xlu1 %v214_v12, %s2665_s17  ;;  %218 = vrot.lane.b32.xlu0 %v213_v11, %s2665_s17 }
  0xb2   : > { %262 = vrot.lane.b32.xlu1 %v257_v13, %s2666_s19  ;;  %264 = vrot.lane.b32.xlu0 %v261_v14, %s2666_s19 }
  0xb6   : > { %274 = vrot.lane.b32.xlu1 %v2818_v16, %s2667_s20  ;;  %276 = vrot.lane.b32.xlu0 %v2821_v17, %s2667_s20 }
  0xba   : > { %286 = vrot.lane.b32.xlu1 %v257_v13, %s2668_s21  ;;  %288 = vrot.lane.b32.xlu0 %v261_v14, %s2668_s21 }
  0xbe   : > { %298 = vrot.lane.b32.xlu1 %v2818_v16, %s2669_s22  ;;  %300 = vrot.lane.b32.xlu0 %v2821_v17, %s2669_s22 }
  0xc2   : > { %310 = vrot.lane.b32.xlu1 %v257_v13, %s2670_s23  ;;  %312 = vrot.lane.b32.xlu0 %v261_v14, %s2670_s23 }
 0x120   : > { %v221_v18 = vpop.permute.xlu1 %220  ;;  %v219_v19 = vpop.permute.xlu0 %218 }
 0x121   : > { %230 = vst.msk [vmem:[#allocation2 + $0x10] sm:$0xff] %vm222_vm0, %v221_v18  ;;  %v2842_v26 = vsel %vm222_vm0, %v219_v19, %v221_v18 }
 0x122   : > { %228 = vst.msk [vmem:[#allocation2] sm:$0xff] %vm227_vm1, %v219_v19  ;;  %v249_v1 = vmul.f32 %v2821_v17, %v2842_v26 }
 0x124   : > { %v263_v20 = vpop.permute.xlu1 %262  ;;  %v265_v21 = vpop.permute.xlu0 %264 }
 0x125   : > { %v267_v36 = vsel %vm266_vm4, %v263_v20, %v265_v21 }
 0x126   : > { %v272_v44 = vmul.f32 %v267_v36, %v2842_v26 }
 0x128   : > { %v252_v23 = vld [vmem:[#allocation2 + $0x10] sm:$0xff]  ;;  %v275_v24 = vpop.permute.xlu1 %274  ;;  %v277_v25 = vpop.permute.xlu0 %276 }
 0x129   : > { %v2837_v22 = vld [vmem:[#allocation2] sm:$0xff]  ;;  %v2444_v27 = vpack.i.bf16 %v252_v23, %v2842_v26  ;;  %v279_v29 = vsel %vm278_vm2, %v275_v24, %v277_v25  ;;  %v285_v33 = vmul.f32 %v277_v25, %v252_v23  ;;  %v273_v38 = vmul.f32 %v265_v21, %v252_v23 }
 0x12a   : > { %366 = vrot.lane.b32.xlu1 %v2837_v22, %s2671_s24  ;;  %327 = vrot.lane.b32.xlu0 %v2837_v22, %s2672_s25  ;;  %v283_v28 = vmul.f32 %v275_v24, %v2837_v22  ;;  %v284_v32 = vmul.f32 %v279_v29, %v2842_v26  ;;  %v271_v37 = vmul.f32 %v263_v20, %v2837_v22 }
 0x12b   : > { %v2454_v45 = vpack.i.bf16 %v273_v38, %v272_v44  ;;  %v248_v3 = vmul.f32 %v2837_v22, %v2818_v16 }
 0x12c   : > { %v287_v30 = vpop.permute.xlu1 %286  ;;  %v289_v31 = vpop.permute.xlu0 %288  ;;  %v2459_v43 = vpack.i.bf16 %v285_v33, %v284_v32 }
 0x12d   : > { %v295_v34 = vmul.f32 %v287_v30, %v2837_v22  ;;  %v291_v35 = vsel %vm290_vm3, %v287_v30, %v289_v31  ;;  %v297_v42 = vmul.f32 %v289_v31, %v252_v23 }
 0x12e   : > { %2445 = vrot.lane.b32.xlu1 %v2444_v27, %s2672_s25  ;;  %355 = vrot.lane.b32.xlu0 %v283_v28, %s2673_s26  ;;  %v296_v41 = vmul.f32 %v291_v35, %v2842_v26 }
 0x130   : > { %v299_v39 = vpop.permute.xlu1 %298  ;;  %v301_v40 = vpop.permute.xlu0 %300  ;;  %v2464_v47 = vpack.i.bf16 %v297_v42, %v296_v41 }
 0x131   : > { %v303_v46 = vsel %vm302_vm5, %v299_v39, %v301_v40  ;;  %v307_v50 = vmul.f32 %v299_v39, %v2837_v22  ;;  %v309_v52 = vmul.f32 %v301_v40, %v252_v23 }
 0x132   : > { %2450 = vrot.lane.b32.xlu1 %v2444_v27, %s2671_s24  ;;  %380 = vrot.lane.b32.xlu0 %v295_v34, %s2674_s27  ;;  %v308_v51 = vmul.f32 %v303_v46, %v2842_v26 }
 0x134   : > { %v311_v48 = vpop.permute.xlu1 %310  ;;  %v313_v49 = vpop.permute.xlu0 %312  ;;  %v2474_v56 = vpack.i.bf16 %v309_v52, %v308_v51 }
 0x135   : > { %v315_v53 = vsel %vm314_vm6, %v311_v48, %v313_v49  ;;  %v321_v55 = vmul.f32 %v313_v49, %v252_v23  ;;  %v319_v58 = vmul.f32 %v311_v48, %v2837_v22 }
 0x136   : > { %341 = vrot.lane.b32.xlu1 %v271_v37, %s2675_s28  ;;  %2460 = vrot.lane.b32.xlu0 %v2459_v43, %s2673_s26  ;;  %v320_v54 = vmul.f32 %v315_v53, %v2842_v26  ;;  %v2898_v53 = vld [vmem:[%s3250_s2 + $0xa8] sm:$0xff] }
 0x138   : > { %v2479_v57 = vpack.i.bf16 %v321_v55, %v320_v54  ;;  %v2903_v54 = vld [vmem:[%s3250_s2 + $0xa0] sm:$0xff] }
 0x13a   : > { %2455 = vrot.lane.b32.xlu1 %v2454_v45, %s2675_s28  ;;  %2465 = vrot.lane.b32.xlu0 %v2464_v47, %s2674_s27 }
 0x13e   : > { %394 = vrot.lane.b32.xlu1 %v307_v50, %s2676_s29  ;;  %2470 = vrot.lane.b32.xlu0 %v2444_v27, %s2677_s30 }
 0x142   : > { %2475 = vrot.lane.b32.xlu1 %v2474_v56, %s2676_s29  ;;  %405 = vrot.lane.b32.xlu0 %v2837_v22, %s2677_s30 }
 0x146   : > { %2480 = vrot.lane.b32.xlu1 %v2479_v57, %s2678_s4  ;;  %419 = vrot.lane.b32.xlu0 %v319_v58, %s2678_s4 }
 0x19c   : > { %v367_v59 = vpop.permute.xlu1 %366  ;;  %v328_v60 = vpop.permute.xlu0 %327 }
 0x1a0   : > { %v2446_v61 = vpop.permute.xlu1 %2445  ;;  %v356_v0 = vpop.permute.xlu0 %355 }
 0x1a1   : > { %v2448_v62 = vunpack.i.h.bf16 %v2446_v61  ;;  %v2447_v63 = vunpack.i.l.bf16 %v2446_v61 }
 0x1a3   : > { %v335_v4 = vsel %vm333_vm7, %v2447_v63, %v2448_v62  ;;  %v334_v5 = vsel %vm333_vm7, %v328_v60, %v2447_v63  ;;  %v215_v60 = vld [vmem:[#allocation5] sm:$0xff] }
 0x1a4   : > { %v2451_v6 = vpop.permute.xlu1 %2450  ;;  %v2232_v9 = vpack.c.bf16 %v335_v4, %v249_v1  ;;  %v2234_v10 = vpack.c.bf16 %v334_v5, %v248_v3  ;;  %v381_v11 = vpop.permute.xlu0 %380  ;;  %v2109_v62 = vld [vmem:[%s3250_s2 + $0xb1] ss:$8 sm:$0x3]  ;;  %v2108_v5 = vld [vmem:[%s3250_s2 + $0xb0] ss:$8 sm:$0x3] }
 0x1a5   : > { %v2453_v17 = vunpack.i.h.bf16 %v2451_v6  ;;  %v2452_v16 = vunpack.i.l.bf16 %v2451_v6  ;;  %v618_v3 = vrot.slane %v2109_v62, %v2801_v7  ;;  %v622_v4 = vrot.slane %v2109_v62, %v2803_v8 }
 0x1a6   : > { %2233 = vmatprep.subr.bf16.mxu0 %v2232_v9  ;;  %v2922_v6 = vrot.slane %v2108_v5, %v2801_v7  ;;  %v2927_v9 = vrot.slane %v2108_v5, %v2803_v8 }
 0x1a7   : > { %2235 = vmatpush1.bf16.msra.mxu0 %v2234_v10  ;;  %v374_v33 = vsel %vm372_vm11, %v2452_v16, %v2453_v17  ;;  %v373_v39 = vsel %vm372_vm11, %v367_v59, %v2452_v16 }
 0x1a8   : > { %v342_v12 = vpop.permute.xlu1 %341  ;;  %v2461_v13 = vpop.permute.xlu0 %2460 }
 0x1a9   : > { %v2463_v14 = vunpack.i.h.bf16 %v2461_v13  ;;  %v2462_v15 = vunpack.i.l.bf16 %v2461_v13 }
 0x1ab   : > { %v363_v25 = vsel %vm361_vm9, %v2462_v15, %v2463_v14  ;;  %v362_v27 = vsel %vm361_vm9, %v356_v0, %v2462_v15 }
 0x1ac   : > { %v2456_v18 = vpop.permute.xlu1 %2455  ;;  %v2466_v19 = vpop.permute.xlu0 %2465 }
 0x1ad   : > { %v2458_v20 = vunpack.i.h.bf16 %v2456_v18  ;;  %v2457_v21 = vunpack.i.l.bf16 %v2456_v18  ;;  %v2468_v22 = vunpack.i.h.bf16 %v2466_v19  ;;  %v2467_v23 = vunpack.i.l.bf16 %v2466_v19 }
 0x1af   : > { %v349_v24 = vsel %vm347_vm8, %v2457_v21, %v2458_v20  ;;  %v348_v26 = vsel %vm347_vm8, %v342_v12, %v2457_v21  ;;  %v388_v31 = vsel %vm386_vm10, %v2467_v23, %v2468_v22  ;;  %v387_v35 = vsel %vm386_vm10, %v381_v11, %v2467_v23 }
 0x1b0   : > { %v395_v28 = vpop.permute.xlu1 %394  ;;  %v2236_v29 = vpack.c.bf16 %v363_v25, %v349_v24  ;;  %v2238_v30 = vpack.c.bf16 %v362_v27, %v348_v26  ;;  %v2471_v32 = vpop.permute.xlu0 %2470  ;;  %v2240_v34 = vpack.c.bf16 %v388_v31, %v374_v33  ;;  %v2242_v43 = vpack.c.bf16 %v387_v35, %v373_v39 }
 0x1b1   : > { %v2473_v36 = vunpack.i.h.bf16 %v2471_v32  ;;  %v2472_v37 = vunpack.i.l.bf16 %v2471_v32 }
 0x1b2   : > { %2237 = vmatprep.subr.bf16.mxu0 %v2236_v29 }
 0x1b3   : > { %2239 = vmatpush1.bf16.msra.mxu0 %v2238_v30  ;;  %v413_v46 = vsel %vm411_vm12, %v2472_v37, %v2473_v36 }
 0x1b4   : > { %v2476_v38 = vpop.permute.xlu1 %2475  ;;  %2241 = vmatprep.subr.bf16.mxu0 %v2240_v34  ;;  %v406_v40 = vpop.permute.xlu0 %405 }
 0x1b5   : > { %v2478_v41 = vunpack.i.h.bf16 %v2476_v38  ;;  %v2477_v42 = vunpack.i.l.bf16 %v2476_v38  ;;  %v412_v44 = vsel %vm411_vm12, %v406_v40, %v2472_v37 }
 0x1b7   : > { %2243 = vmatpush1.bf16.msra.mxu0 %v2242_v43  ;;  %v402_v45 = vsel %vm400_vm13, %v2477_v42, %v2478_v41  ;;  %v401_v47 = vsel %vm400_vm13, %v395_v28, %v2477_v42 }
 0x1b8   : > { %v2481_v48 = vpop.permute.xlu1 %2480  ;;  %v2244_v49 = vpack.c.bf16 %v413_v46, %v402_v45  ;;  %v2246_v50 = vpack.c.bf16 %v412_v44, %v401_v47  ;;  %v420_v55 = vpop.permute.xlu0 %419 }
 0x1b9   : > { %v2483_v51 = vunpack.i.h.bf16 %v2481_v48  ;;  %v2482_v52 = vunpack.i.l.bf16 %v2481_v48 }
 0x1ba   : > { %2245 = vmatprep.subr.bf16.mxu0 %v2244_v49 }
 0x1bb   : > { %2247 = vmatpush1.bf16.msra.mxu0 %v2246_v50  ;;  %v427_v56 = vsel %vm425_vm14, %v2482_v52, %v2483_v51  ;;  %v426_v57 = vsel %vm425_vm14, %v420_v55, %v2482_v52 }
 0x1bc   : > { %v2248_v58 = vpack.c.bf16 %v2898_v53, %v427_v56  ;;  %v2250_v59 = vpack.c.bf16 %v2903_v54, %v426_v57 }
 0x1be   : > { %2249 = vmatprep.subr.bf16.mxu0 %v2248_v58 }
 0x1bf   : > { %2251 = vmatpush1.bf16.msra.mxu0 %v2250_v59 }
 0x1c2   : > { %2107 = vmatmul.mubr.msk.f32.vlgmr.msra.gmra.mrb[0].mxu0 %vm430_vm15, %v215_v60 }
 0x295   : > { %v500_v61 = vpop.f32.mrb[0].mxu0 }
 0x296   : > { %v578_v63 = vmax.f32 %v500_v61, 0.0  ;;  %v502_v0 = vpop.f32.mrb[1].mxu0 }
 0x297   : > { %v579_v1 = vmax.f32 %v502_v0, 0.0  ;;  %505 = vmatprep.subr.mxu1 %v502_v0  ;;  %569 = vmatprep.mubr.f32.mxu1 %v502_v0 }
 0x298   : > { %583 = vrot.lane.b32.xlu1 %v578_v63, %s2665_s17  ;;  %506 = vmatpush1.xpose.msra.mxu1 %v500_v61 }
 0x299   : > { %585 = vrot.lane.b32.xlu0 %v579_v1, %s2665_s17 }
 0x29b   : > { %570 = vmatmul.mubr.f32.vlgmr.msra.gmra.mrb[0].mxu1 %v500_v61 }
 0x29c   : > { %623 = vrot.lane.b32.xlu1 %v618_v3, %s2666_s19  ;;  %845 = vmatprep.mubr.f32.mxu1 %v2664_v2 }
 0x29d   : > { %625 = vrot.lane.b32.xlu0 %v622_v4, %s2666_s19 }
 0x2a0   : > { %634 = vrot.lane.b32.xlu1 %v2922_v6, %s2667_s20 }
 0x2a1   : > { %636 = vrot.lane.b32.xlu0 %v2927_v9, %s2667_s20 }
 0x2a4   : > { %645 = vrot.lane.b32.xlu1 %v618_v3, %s2668_s21 }
 0x2a5   : > { %647 = vrot.lane.b32.xlu0 %v622_v4, %s2668_s21 }
 0x2a8   : > { %656 = vrot.lane.b32.xlu1 %v2922_v6, %s2669_s22 }
 0x2a9   : > { %658 = vrot.lane.b32.xlu0 %v2927_v9, %s2669_s22  ;;  %s2681_s22 = smov 8  }
 0x2ac   : > { %667 = vrot.lane.b32.xlu1 %v618_v3, %s2670_s23 }
 0x2ad   : > { %669 = vrot.lane.b32.xlu0 %v622_v4, %s2670_s23  ;;  %s2682_s23 = smov 120  }
 0x30a   : > { %v584_v2 = vpop.permute.xlu1 %583 }
 0x30b   : > { %591 = vst.msk [vmem:[#allocation2] sm:$0xff] %vm227_vm1, %v584_v2  ;;  %v586_v7 = vpop.permute.xlu0 %585 }
 0x30c   : > { %593 = vst.msk [vmem:[#allocation2 + $0x10] sm:$0xff] %vm222_vm0, %v586_v7  ;;  %v2946_v13 = vsel %vm222_vm0, %v584_v2, %v586_v7 }
 0x30d   : > { %v610_v60 = vmul.f32 %v2927_v9, %v2946_v13 }
 0x30e   : > { %v624_v8 = vpop.permute.xlu1 %623 }
 0x30f   : > { %v626_v10 = vpop.permute.xlu0 %625 }
 0x310   : > { %v627_v26 = vsel %vm266_vm4, %v624_v8, %v626_v10 }
 0x311   : > { %v632_v33 = vmul.f32 %v627_v26, %v2946_v13 }
 0x312   : > { %v2943_v11 = vld [vmem:[#allocation2] sm:$0xff]  ;;  %v635_v12 = vpop.permute.xlu1 %634 }
 0x313   : > { %v613_v14 = vld [vmem:[#allocation2 + $0x10] sm:$0xff]  ;;  %719 = vrot.lane.b32.xlu1 %v2943_v11, %s2671_s24  ;;  %683 = vrot.lane.b32.xlu0 %v2943_v11, %s2672_s25  ;;  %v637_v15 = vpop.permute.xlu0 %636  ;;  %v642_v17 = vmul.f32 %v635_v12, %v2943_v11  ;;  %v631_v21 = vmul.f32 %v624_v8, %v2943_v11  ;;  %v609_v59 = vmul.f32 %v2943_v11, %v2922_v6 }
 0x314   : > { %v2484_v18 = vpack.i.bf16 %v613_v14, %v2946_v13  ;;  %v638_v16 = vsel %vm278_vm2, %v635_v12, %v637_v15  ;;  %v644_v23 = vmul.f32 %v637_v15, %v613_v14  ;;  %v633_v27 = vmul.f32 %v626_v10, %v613_v14 }
 0x315   : > { %v643_v22 = vmul.f32 %v638_v16, %v2946_v13 }
 0x316   : > { %v646_v19 = vpop.permute.xlu1 %645  ;;  %v2494_v34 = vpack.i.bf16 %v633_v27, %v632_v33 }
 0x317   : > { %709 = vrot.lane.b32.xlu0 %v642_v17, %s2673_s26  ;;  %2485 = vrot.lane.b32.xlu1 %v2484_v18, %s2672_s25  ;;  %v648_v20 = vpop.permute.xlu0 %647  ;;  %v653_v24 = vmul.f32 %v646_v19, %v2943_v11  ;;  %v2499_v28 = vpack.i.bf16 %v644_v23, %v643_v22 }
 0x318   : > { %v649_v25 = vsel %vm290_vm3, %v646_v19, %v648_v20  ;;  %v655_v30 = vmul.f32 %v648_v20, %v613_v14  ;;  %vm576_vm3 = vcmask 64512  }
 0x319   : > { %v654_v29 = vmul.f32 %v649_v25, %v2946_v13 }
 0x31a   : > { %v657_v31 = vpop.permute.xlu1 %656 }
 0x31b   : > { %732 = vrot.lane.b32.xlu0 %v653_v24, %s2674_s27  ;;  %696 = vrot.lane.b32.xlu1 %v631_v21, %s2675_s28  ;;  %v659_v32 = vpop.permute.xlu0 %658  ;;  %v2504_v35 = vpack.i.bf16 %v655_v30, %v654_v29  ;;  %v664_v39 = vmul.f32 %v657_v31, %v2943_v11 }
 0x31c   : > { %v660_v36 = vsel %vm302_vm5, %v657_v31, %v659_v32  ;;  %v666_v41 = vmul.f32 %v659_v32, %v613_v14 }
 0x31d   : > { %v665_v40 = vmul.f32 %v660_v36, %v2946_v13 }
 0x31e   : > { %v668_v37 = vpop.permute.xlu1 %667 }
 0x31f   : > { %2490 = vrot.lane.b32.xlu1 %v2484_v18, %s2671_s24  ;;  %2500 = vrot.lane.b32.xlu0 %v2499_v28, %s2673_s26  ;;  %v670_v38 = vpop.permute.xlu0 %669  ;;  %v2514_v43 = vpack.i.bf16 %v666_v41, %v665_v40  ;;  %v675_v46 = vmul.f32 %v668_v37, %v2943_v11 }
 0x320   : > { %v671_v42 = vsel %vm314_vm6, %v668_v37, %v670_v38  ;;  %v677_v45 = vmul.f32 %v670_v38, %v613_v14  ;;  %vm1417_vm6 = vcmask 195584  }
 0x321   : > { %v676_v44 = vmul.f32 %v671_v42, %v2946_v13 }
 0x323   : > { %2495 = vrot.lane.b32.xlu1 %v2494_v34, %s2675_s28  ;;  %2505 = vrot.lane.b32.xlu0 %v2504_v35, %s2674_s27  ;;  %v2519_v47 = vpack.i.bf16 %v677_v45, %v676_v44 }
 0x327   : > { %745 = vrot.lane.b32.xlu1 %v664_v39, %s2676_s29  ;;  %2510 = vrot.lane.b32.xlu0 %v2484_v18, %s2677_s30 }
 0x32b   : > { %755 = vrot.lane.b32.xlu0 %v2943_v11, %s2677_s30  ;;  %2515 = vrot.lane.b32.xlu1 %v2514_v43, %s2676_s29  ;;  %s2683_s29 = smov 119   ;;  %s2684_s30 = smov 118  }
 0x32f   : > { %768 = vrot.lane.b32.xlu0 %v675_v46, %s2678_s4  ;;  %2520 = vrot.lane.b32.xlu1 %v2519_v47, %s2678_s4 }
 0x36e   : > { %v571_v48 = vpop.f32.mrb[0].mxu1 }
 0x36f   : > { %v575_v49 = vmul.f32 0.00048828125, %v571_v48  ;;  %v573_v50 = vpop.f32.mrb[1].mxu1 }
 0x371   : > { %577 = vst.msk [vmem:[%s2765_s8 + $0x10] sm:$0xff] %vm576_vm3, %v575_v49  ;;  %v580_v49 = vld [vmem:[#allocation5 + $0x10] sm:$0xff] }
 0x385   : > { %v720_v51 = vpop.permute.xlu1 %719  ;;  %v684_v52 = vpop.permute.xlu0 %683 }
 0x389   : > { %v2486_v55 = vpop.permute.xlu1 %2485  ;;  %v710_v56 = vpop.permute.xlu0 %709 }
 0x38a   : > { %v2488_v57 = vunpack.i.h.bf16 %v2486_v55  ;;  %v2487_v58 = vunpack.i.l.bf16 %v2486_v55 }
 0x38c   : > { %v689_v61 = vsel %vm333_vm7, %v684_v52, %v2487_v58  ;;  %v690_v62 = vsel %vm333_vm7, %v2487_v58, %v2488_v57 }
 0x38d   : > { %v2254_v63 = vpack.c.bf16 %v689_v61, %v609_v59  ;;  %v697_v0 = vpop.permute.xlu1 %696  ;;  %v733_v1 = vpop.permute.xlu0 %732  ;;  %v2252_v3 = vpack.c.bf16 %v690_v62, %v610_v60 }
 0x38f   : > { %2253 = vmatprep.subr.bf16.mxu1 %v2252_v3 }
 0x390   : > { %2255 = vmatpush1.bf16.msra.mxu1 %v2254_v63 }
 0x391   : > { %v2491_v4 = vpop.permute.xlu1 %2490  ;;  %v2501_v5 = vpop.permute.xlu0 %2500 }
 0x392   : > { %v2502_v2 = vunpack.i.l.bf16 %v2501_v5  ;;  %v2503_v7 = vunpack.i.h.bf16 %v2501_v5  ;;  %v2493_v8 = vunpack.i.h.bf16 %v2491_v4  ;;  %v2492_v10 = vunpack.i.l.bf16 %v2491_v4  ;;  %v977_v5 = vld [vmem:[%s3250_s2 + $0x8] sm:$0xff] }
 0x394   : > { %v715_v15 = vsel %vm361_vm9, %v710_v56, %v2502_v2  ;;  %v716_v16 = vsel %vm361_vm9, %v2502_v2, %v2503_v7  ;;  %v726_v24 = vsel %vm372_vm11, %v2492_v10, %v2493_v8  ;;  %v725_v29 = vsel %vm372_vm11, %v720_v51, %v2492_v10  ;;  %v979_v2 = vld [vmem:[%s3250_s2 + $0x18] sm:$0xff]  ;;  %v976_v7 = vld [vmem:[%s3250_s2] sm:$0xff] }
 0x395   : > { %v2496_v6 = vpop.permute.xlu1 %2495  ;;  %v2506_v11 = vpop.permute.xlu0 %2505 }
 0x396   : > { %v2498_v12 = vunpack.i.h.bf16 %v2496_v6  ;;  %v2497_v9 = vunpack.i.l.bf16 %v2496_v6  ;;  %v2508_v13 = vunpack.i.h.bf16 %v2506_v11  ;;  %v2507_v14 = vunpack.i.l.bf16 %v2506_v11 }
 0x397   : > { %v2272_v11 = vpack.c.bf16 %v979_v2, %v977_v5 }
 0x398   : > { %v702_v18 = vsel %vm347_vm8, %v697_v0, %v2497_v9  ;;  %v703_v17 = vsel %vm347_vm8, %v2497_v9, %v2498_v12  ;;  %v739_v19 = vsel %vm386_vm10, %v2507_v14, %v2508_v13  ;;  %v738_v25 = vsel %vm386_vm10, %v733_v1, %v2507_v14  ;;  %v978_v12 = vld [vmem:[%s3250_s2 + $0x10] sm:$0xff]  ;;  %v981_v9 = vld [vmem:[%s3250_s2 + $0x28] sm:$0xff]  ;;  %v983_v13 = vld [vmem:[%s3250_s2 + $0x38] sm:$0xff] }
 0x399   : > { %v2258_v20 = vpack.c.bf16 %v715_v15, %v702_v18  ;;  %v746_v21 = vpop.permute.xlu1 %745  ;;  %v2511_v22 = vpop.permute.xlu0 %2510  ;;  %v2256_v23 = vpack.c.bf16 %v716_v16, %v703_v17  ;;  %v2260_v26 = vpack.c.bf16 %v739_v19, %v726_v24  ;;  %v2262_v32 = vpack.c.bf16 %v738_v25, %v725_v29  ;;  %2273 = vmatprep.subr.bf16.mxu0 %v2272_v11  ;;  %v980_v19 = vld [vmem:[%s3250_s2 + $0x20] sm:$0xff]  ;;  %vm2381_vm8 = vmpackc.low %vm278_vm2, %vm278_vm2 }
 0x39a   : > { %v2513_v27 = vunpack.i.h.bf16 %v2511_v22  ;;  %v2512_v28 = vunpack.i.l.bf16 %v2511_v22  ;;  %v2274_v18 = vpack.c.bf16 %v978_v12, %v976_v7  ;;  %v2276_v17 = vpack.c.bf16 %v983_v13, %v981_v9  ;;  %v987_v22 = vld [vmem:[%s3250_s2 + $0x58] sm:$0xff]  ;;  %v984_v25 = vld [vmem:[%s3250_s2 + $0x40] sm:$0xff] }
 0x39b   : > { %2257 = vmatprep.subr.bf16.mxu1 %v2256_v23 }
 0x39c   : > { %2259 = vmatpush1.bf16.msra.mxu1 %v2258_v20  ;;  %v762_v38 = vsel %vm411_vm12, %v2512_v28, %v2513_v27  ;;  %2275 = vmatpush1.bf16.xpose.msra.mxu0 %v2274_v18  ;;  %v982_v20 = vld [vmem:[%s3250_s2 + $0x30] sm:$0xff]  ;;  %v989_v27 = vld [vmem:[%s3250_s2 + $0x68] sm:$0xff] }
 0x39d   : > { %v2516_v30 = vpop.permute.xlu1 %2515  ;;  %v756_v31 = vpop.permute.xlu0 %755  ;;  %2261 = vmatprep.subr.bf16.mxu1 %v2260_v26  ;;  %2277 = vmatprep.subr.bf16.mxu0 %v2276_v17  ;;  %v2278_v23 = vpack.c.bf16 %v982_v20, %v980_v19  ;;  %v986_v26 = vld [vmem:[%s3250_s2 + $0x50] sm:$0xff] }
 0x39e   : > { %v2518_v33 = vunpack.i.h.bf16 %v2516_v30  ;;  %v2517_v34 = vunpack.i.l.bf16 %v2516_v30  ;;  %v761_v36 = vsel %vm411_vm12, %v756_v31, %v2512_v28  ;;  %v991_v28 = vld [vmem:[%s3250_s2 + $0x78] sm:$0xff]  ;;  %v2282_v29 = vpack.c.bf16 %v986_v26, %v984_v25  ;;  %v988_v31 = vld [vmem:[%s3250_s2 + $0x60] sm:$0xff] }
 0x39f   : > { %v2284_v30 = vpack.c.bf16 %v991_v28, %v989_v27  ;;  %v2685_v25 = vmov 0.0|0.0  }
 0x3a0   : > { %v751_v35 = vsel %vm400_vm13, %v746_v21, %v2517_v34  ;;  %2263 = vmatpush1.bf16.msra.mxu1 %v2262_v32  ;;  %v752_v37 = vsel %vm400_vm13, %v2517_v34, %v2518_v33  ;;  %v985_v21 = vld [vmem:[%s3250_s2 + $0x48] sm:$0xff]  ;;  %v990_v32 = vld [vmem:[%s3250_s2 + $0x70] sm:$0xff] }
 0x3a1   : > { %v2266_v39 = vpack.c.bf16 %v761_v36, %v751_v35  ;;  %v2521_v40 = vpop.permute.xlu1 %2520  ;;  %v2264_v41 = vpack.c.bf16 %v762_v38, %v752_v37  ;;  %v769_v44 = vpop.permute.xlu0 %768  ;;  %v2280_v24 = vpack.c.bf16 %v987_v22, %v985_v21  ;;  %v2286_v33 = vpack.c.bf16 %v990_v32, %v988_v31 }
 0x3a2   : > { %v2523_v42 = vunpack.i.h.bf16 %v2521_v40  ;;  %v2522_v43 = vunpack.i.l.bf16 %v2521_v40 }
 0x3a3   : > { %2265 = vmatprep.subr.bf16.mxu1 %v2264_v41 }
 0x3a4   : > { %v774_v45 = vsel %vm425_vm14, %v769_v44, %v2522_v43  ;;  %2267 = vmatpush1.bf16.msra.mxu1 %v2266_v39  ;;  %v775_v46 = vsel %vm425_vm14, %v2522_v43, %v2523_v42  ;;  %2279 = vmatpush1.bf16.xpose.msra.mxu0 %v2278_v23 }
 0x3a5   : > { %v2270_v47 = vpack.c.bf16 %v2903_v54, %v774_v45  ;;  %v2268_v48 = vpack.c.bf16 %v2898_v53, %v775_v46  ;;  %2281 = vmatprep.subr.bf16.mxu0 %v2280_v24 }
 0x3a7   : > { %2269 = vmatprep.subr.bf16.mxu1 %v2268_v48 }
 0x3a8   : > { %2271 = vmatpush1.bf16.msra.mxu1 %v2270_v47 }
 0x3ab   : > { %2110 = vmatmul.mubr.msk.f32.vlgmr.msra.gmra.mrb[2].mxu1 %vm430_vm15, %v580_v49 }
 0x3ac   : > { %2283 = vmatpush1.bf16.xpose.msra.mxu0 %v2282_v29 }
 0x3ad   : > { %2285 = vmatprep.subr.bf16.mxu0 %v2284_v30 }
 0x3b4   : > { %2287 = vmatpush1.bf16.xpose.msra.mxu0 %v2286_v33 }
 0x47e   : > { %v847_v50 = vpop.f32.mrb[2].mxu1 }
 0x47f   : > { %v924_v51 = vmax.f32 %v847_v50, 0.0  ;;  %v849_v52 = vpop.f32.mrb[3].mxu1 }
 0x480   : > { %v925_v55 = vmax.f32 %v849_v52, 0.0  ;;  %852 = vmatprep.subr.mxu1 %v849_v52  ;;  %916 = vmatprep.mubr.f32.mxu1 %v849_v52 }
 0x481   : > { %928 = vrot.lane.b32.xlu1 %v924_v51, %s2665_s17  ;;  %853 = vmatpush1.xpose.msra.mxu1 %v847_v50 }
 0x482   : > { %930 = vrot.lane.b32.xlu0 %v925_v55, %s2665_s17  ;;  %s2680_s17 = smov 9   ;;  %v3090_v55 = vld [vmem:[%s3250_s2 + $0xb2] ss:$0 sm:$0xff] }
 0x484   : > { %917 = vmatmul.mubr.f32.vlgmr.msra.gmra.mrb[4].mxu1 %v847_v50  ;;  %v3078_v50 = vld [vmem:[%s3250_s2 + $0xb3] ss:$0 sm:$0xff] }
 0x4f3   : > { %v929_v56 = vpop.permute.xlu1 %928 }
 0x4f4   : > { %936 = vst.msk [vmem:[#allocation2] sm:$0xff] %vm227_vm1, %v929_v56  ;;  %v931_v53 = vpop.permute.xlu0 %930  ;;  %vm1221_vm1 = vcmask 523264  }
 0x4f5   : > { %v932_v57 = vsel %vm222_vm0, %v929_v56, %v931_v53  ;;  %938 = vst.msk [vmem:[#allocation2 + $0x10] sm:$0xff] %vm222_vm0, %v931_v53  ;;  %vm1081_vm0 = vcmask 597064   ;;  %vm3111_vm4 = vmpackc.low %vm1221_vm1, %vm1221_vm1 }
 0x4fb   : > { %v939_v58 = vld [vmem:[#allocation2] sm:$0xff] }
 0x4fc   : > { %945 = vrot.lane.b32.xlu0 %v939_v58, %s2672_s25  ;;  %v941_v59 = vld [vmem:[#allocation2 + $0x10] sm:$0xff] }
 0x4fd   : > { %v2524_v60 = vpack.i.bf16 %v941_v59, %v932_v57 }
 0x4ff   : > { %2525 = vrot.lane.b32.xlu1 %v2524_v60, %s2672_s25 }
 0x557   : > { %v918_v61 = vpop.f32.mrb[4].mxu1 }
 0x558   : > { %v922_v62 = vmul.f32 0.00048828125, %v918_v61  ;;  %v920_v63 = vpop.f32.mrb[5].mxu1 }
 0x55a   : > { %923 = vst.msk [vmem:[%s2765_s8 + $0x18] sm:$0xff] %vm576_vm3, %v922_v62 }
 0x56e   : > { %v946_v4 = vpop.permute.xlu0 %945 }
 0x571   : > { %v2526_v0 = vpop.permute.xlu1 %2525 }
 0x572   : > { %v2528_v1 = vunpack.i.h.bf16 %v2526_v0  ;;  %v2527_v3 = vunpack.i.l.bf16 %v2526_v0  ;;  %v1075_v0 = vld [vmem:[#allocation5 + $0x20] sm:$0xff] }
 0x573   : > { %2194 = vmatprep.mubr.msk.f32.mxu1 %vm430_vm15, %v1075_v0 }
 0x574   : > { %v958_v8 = vmax.f32 %v941_v59, %v2528_v1  ;;  %v952_v10 = vsel %vm333_vm7, %v2527_v3, %v2528_v1  ;;  %v951_v6 = vsel %vm333_vm7, %v946_v4, %v2527_v3  ;;  %vm1729_vm7 = vcmask 171048  }
 0x575   : > { %v956_v14 = vmax.f32 %v939_v58, %v951_v6  ;;  %v957_v15 = vmax.f32 %v932_v57, %v952_v10 }
 0x577   : > { %962 = vrot.lane.b32.xlu0 %v956_v14, %s2673_s26  ;;  %v2529_v16 = vpack.i.bf16 %v958_v8, %v957_v15 }
 0x579   : > { %2530 = vrot.lane.b32.xlu1 %v2529_v16, %s2673_s26  ;;  %v1076_v16 = vld [vmem:[#allocation5 + $0x30] sm:$0xff] }
 0x5e9   : > { %v963_v37 = vpop.permute.xlu0 %962 }
 0x5eb   : > { %v2531_v34 = vpop.permute.xlu1 %2530 }
 0x5ec   : > { %v2533_v35 = vunpack.i.h.bf16 %v2531_v34  ;;  %v2532_v36 = vunpack.i.l.bf16 %v2531_v34 }
 0x5ee   : > { %v975_v38 = vmax.f32 %v958_v8, %v2533_v35  ;;  %v969_v39 = vsel %vm361_vm9, %v2532_v36, %v2533_v35  ;;  %v968_v40 = vsel %vm361_vm9, %v963_v37, %v2532_v36 }
 0x5ef   : > { %v973_v41 = vmax.f32 %v956_v14, %v968_v40  ;;  %v974_v42 = vmax.f32 %v957_v15, %v969_v39 }
 0x5f1   : > { %995 = vrot.lane.b32.xlu0 %v973_v41, %s2671_s24  ;;  %v2534_v43 = vpack.i.bf16 %v975_v38, %v974_v42 }
 0x5f3   : > { %2535 = vrot.lane.b32.xlu1 %v2534_v43, %s2671_s24 }
 0x5f5   : > { %1088 = vrot.lane.b32.xlu0 %v3078_v50, %s2666_s19 }
 0x5f9   : > { %1097 = vrot.lane.b32.xlu0 %v3078_v50, %s2679_s16 }
 0x5fd   : > { %1105 = vrot.lane.b32.xlu0 %v3078_v50, %s2668_s21 }
 0x663   : > { %v996_v47 = vpop.permute.xlu0 %995 }
 0x665   : > { %v2536_v44 = vpop.permute.xlu1 %2535 }
 0x666   : > { %v2538_v45 = vunpack.i.h.bf16 %v2536_v44  ;;  %v2537_v46 = vunpack.i.l.bf16 %v2536_v44 }
 0x667   : > { %v1089_v53 = vpop.permute.xlu0 %1088 }
 0x668   : > { %v1002_v48 = vsel %vm372_vm11, %v2537_v46, %v2538_v45  ;;  %v1001_v49 = vsel %vm372_vm11, %v996_v47, %v2537_v46 }
 0x669   : > { %1069 = vmatprep.mubr.f32.mxu0 %v1002_v48 }
 0x66a   : > { %1070 = vmatmul.mubr.f32.vlgmr.msra.gmra.mrb[2].mxu0 %v1001_v49 }
 0x66b   : > { %v1098_v61 = vpop.permute.xlu0 %1097 }
 0x66f   : > { %v1106_v3 = vpop.permute.xlu0 %1105 }
 0x73d   : > { %v1071_v51 = vpop.f32.mrb[2].mxu0 }
 0x73e   : > { %1078 = vrot.lane.b32.xlu1 %v1071_v51, %s2680_s17  ;;  %v1073_v52 = vpop.f32.mrb[3].mxu0 }
 0x742   : > { %1093 = vrot.lane.b32.xlu1 %v3090_v55, %s2681_s22 }
 0x746   : > { %1101 = vrot.lane.b32.xlu1 %v3090_v55, %s2667_s20 }
 0x7b0   : > { %v1079_v56 = vpop.permute.xlu1 %1078 }
 0x7b1   : > { %1082 = vst.msk [vmem:[#allocation3] sm:$0xff] %vm1081_vm0, %v1079_v56  ;;  %v1310_v56 = vld [vmem:[#allocation5 + $0x48] sm:$0xff] }
 0x7b4   : > { %v1094_v58 = vpop.permute.xlu1 %1093 }
 0x7b8   : > { %v1085_v57 = vld [vmem:[#allocation3] sm:$0xff]  ;;  %v1102_v62 = vpop.permute.xlu1 %1101 }
 0x7b9   : > { %v1091_v59 = vmul.f32 %v1089_v53, %v1085_v57  ;;  %1111 = vrot.lane.b32.xlu1 %v1085_v57, %s2672_s25  ;;  %v1096_v60 = vmul.f32 %v1094_v58, %v1085_v57  ;;  %v1100_v63 = vmul.f32 %v1098_v61, %v1085_v57  ;;  %v1104_v1 = vmul.f32 %v1102_v62, %v1085_v57 }
 0x7ba   : > { %v1108_v4 = vmul.f32 %v1106_v3, %v1085_v57  ;;  %v1086_v5 = vmul.f32 %v1085_v57, %v3090_v55 }
 0x7bb   : > { %1115 = vrot.lane.b32.xlu0 %v1091_v59, %s2675_s28 }
 0x7bd   : > { %1119 = vrot.lane.b32.xlu1 %v1096_v60, %s2682_s23 }
 0x7bf   : > { %1122 = vrot.lane.b32.xlu0 %v1085_v57, %s2683_s29 }
 0x7c1   : > { %1126 = vrot.lane.b32.xlu1 %v1100_v63, %s2684_s30 }
 0x7c3   : > { %1130 = vrot.lane.b32.xlu0 %v1104_v1, %s2673_s26 }
 0x7c5   : > { %1133 = vrot.lane.b32.xlu1 %v1085_v57, %s2671_s24 }
 0x7c7   : > { %1137 = vrot.lane.b32.xlu0 %v1108_v4, %s2674_s27 }
 0x82b   : > { %v1112_v2 = vpop.permute.xlu1 %1111 }
 0x82c   : > { %v2288_v7 = vpack.c.bf16 %v1112_v2, %v1086_v5 }
 0x82d   : > { %v1116_v8 = vpop.permute.xlu0 %1115 }
 0x82e   : > { %2289 = vmatprep.subr.bf16.mxu1 %v2288_v7 }
 0x82f   : > { %v1120_v10 = vpop.permute.xlu1 %1119  ;;  %2291 = vmatpush3.bf16.msra.mxu1 %v2288_v7 }
 0x830   : > { %v2292_v6 = vpack.c.bf16 %v1120_v10, %v1116_v8 }
 0x831   : > { %v1123_v11 = vpop.permute.xlu0 %1122 }
 0x832   : > { %2293 = vmatprep.subr.bf16.mxu1 %v2292_v6 }
 0x833   : > { %v1127_v12 = vpop.permute.xlu1 %1126  ;;  %2295 = vmatpush3.bf16.msra.mxu1 %v2292_v6 }
 0x834   : > { %v2296_v9 = vpack.c.bf16 %v1127_v12, %v1123_v11 }
 0x835   : > { %v1131_v13 = vpop.permute.xlu0 %1130 }
 0x836   : > { %2297 = vmatprep.subr.bf16.mxu1 %v2296_v9 }
 0x837   : > { %v1134_v14 = vpop.permute.xlu1 %1133  ;;  %2299 = vmatpush3.bf16.msra.mxu1 %v2296_v9 }
 0x838   : > { %v2300_v15 = vpack.c.bf16 %v1134_v14, %v1131_v13 }
 0x839   : > { %v1138_v18 = vpop.permute.xlu0 %1137 }
 0x83a   : > { %v2304_v17 = vpack.c.bf16 %v2903_v54, %v1138_v18  ;;  %2301 = vmatprep.subr.bf16.mxu1 %v2300_v15 }
 0x83b   : > { %2303 = vmatpush3.bf16.msra.mxu1 %v2300_v15 }
 0x83c   : > { %2305 = vmatprep.subr.bf16.mxu1 %v2304_v17 }
 0x83f   : > { %2307 = vmatpush3.bf16.msra.mxu1 %v2304_v17 }
 0x842   : > { %2195 = vmatmul.mubr.msk.f32.vlgmr.msra.gmra.mrb[6].mxu1 %vm430_vm15, %v1076_v16 }
 0x915   : > { %v2196_v19 = vpop.f32.mrb[6].mxu1 }
 0x916   : > { %v1308_v20 = vmax.f32 %v2196_v19, 0.0  ;;  %v1212_v21 = vpop.f32.mrb[7].mxu1 }
 0x917   : > { %v2308_v23 = vpack.c.bf16 %v2196_v19, %v1212_v21  ;;  %v1307_v24 = vmax.f32 %v1212_v21, 0.0  ;;  %2201 = vmatprep.mubr.msk.f32.mxu1 %vm1221_vm1, %v1212_v21 }
 0x918   : > { %1317 = vrot.lane.b32.xlu0 %v1308_v20, %s2680_s17 }
 0x919   : > { %1315 = vrot.lane.b32.xlu1 %v1307_v24, %s2680_s17  ;;  %2310 = vmatprep.subr.msk.bf16.mxu1 %vm3111_vm4, %v2308_v23 }
 0x91a   : > { %2313 = vmatpush3.bf16.xpose.msk.msra.mxu1 %vm3111_vm4, %v2308_v23 }
 0x91b   : > { %2314 = vmatprep.subr.bf16.mxu1 %v2685_v25 }
 0x91c   : > { %1336 = vrot.lane.b32.xlu0 %v3090_v55, %s2681_s22 }
 0x91d   : > { %1330 = vrot.lane.b32.xlu1 %v3078_v50, %s2666_s19 }
 0x920   : > { %1346 = vrot.lane.b32.xlu0 %v3090_v55, %s2667_s20 }
 0x921   : > { %1341 = vrot.lane.b32.xlu1 %v3078_v50, %s2679_s16  ;;  %2202 = vmatmul.mubr.msk.f32.vlgmr.msra.gmra.mrb[8].mxu1 %vm1221_vm1, %v2196_v19 }
 0x922   : > { %2117 = vmatprep.mubr.msk.f32.mxu1 %vm1417_vm6, %v1310_v56 }
 0x925   : > { %1351 = vrot.lane.b32.xlu1 %v3078_v50, %s2668_s21 }
 0x98a   : > { %v1318_v26 = vpop.permute.xlu0 %1317 }
 0x98b   : > { %1322 = vst.msk [vmem:[#allocation3 + $0x8] sm:$0xff] %vm1081_vm0, %v1318_v26  ;;  %v1316_v27 = vpop.permute.xlu1 %1315 }
 0x98c   : > { %1321 = vst.msk [vmem:[#allocation3] sm:$0xff] %vm1081_vm0, %v1316_v27 }
 0x98e   : > { %v1337_v29 = vpop.permute.xlu0 %1336 }
 0x98f   : > { %v1331_v28 = vpop.permute.xlu1 %1330 }
 0x992   : > { %v1326_v30 = vld [vmem:[#allocation3 + $0x8] sm:$0xff]  ;;  %v1347_v41 = vpop.permute.xlu0 %1346 }
 0x993   : > { %v1325_v31 = vld [vmem:[#allocation3] sm:$0xff]  ;;  %v1334_v32 = vmul.f32 %v1331_v28, %v1326_v30  ;;  %v1328_v33 = vmul.f32 %v1326_v30, %v3090_v55  ;;  %v1340_v36 = vmul.f32 %v1337_v29, %v1326_v30  ;;  %v1342_v37 = vpop.permute.xlu1 %1341  ;;  %v1350_v47 = vmul.f32 %v1347_v41, %v1326_v30 }
 0x994   : > { %v1333_v34 = vmul.f32 %v1331_v28, %v1325_v31  ;;  %v1339_v35 = vmul.f32 %v1337_v29, %v1325_v31  ;;  %v2539_v38 = vpack.i.bf16 %v1326_v30, %v1325_v31  ;;  %v1327_v39 = vmul.f32 %v1325_v31, %v3090_v55 }
 0x995   : > { %v1344_v44 = vmul.f32 %v1342_v37, %v1325_v31  ;;  %v1345_v45 = vmul.f32 %v1342_v37, %v1326_v30  ;;  %v1349_v46 = vmul.f32 %v1347_v41, %v1325_v31 }
 0x996   : > { %v2544_v40 = vpack.i.bf16 %v1334_v32, %v1333_v34  ;;  %2540 = vrot.lane.b32.xlu0 %v2539_v38, %s2672_s25  ;;  %v2315_v42 = vpack.c.bf16 %v1328_v33, %v1327_v39  ;;  %v2549_v43 = vpack.i.bf16 %v1340_v36, %v1339_v35  ;;  %v1312_v32 = vld [vmem:[#allocation5 + $0x58] sm:$0xff]  ;;  %v1311_v33 = vld [vmem:[#allocation5 + $0x50] sm:$0xff] }
 0x997   : > { %v1352_v48 = vpop.permute.xlu1 %1351  ;;  %v2559_v49 = vpack.i.bf16 %v1345_v45, %v1344_v44  ;;  %v2564_v50 = vpack.i.bf16 %v1350_v47, %v1349_v46 }
 0x998   : > { %2545 = vrot.lane.b32.xlu1 %v2544_v40, %s2675_s28  ;;  %2316 = vmatpush1.bf16.msra.mxu1 %v2315_v42  ;;  %v1354_v51 = vmul.f32 %v1352_v48, %v1325_v31  ;;  %v1355_v52 = vmul.f32 %v1352_v48, %v1326_v30  ;;  %v3159_v30 = vld [vmem:[#allocation4] sm:$0xff]  ;;  %v1309_v31 = vld [vmem:[#allocation5 + $0x40] sm:$0xff]  ;;  %v1620_v48 = vld [vmem:[%s3250_s2 + $0x80] sm:$0xff] }
 0x999   : > { %2317 = vmatprep.subr.bf16.mxu1 %v2685_v25 }
 0x99a   : > { %2550 = vrot.lane.b32.xlu0 %v2549_v43, %s2682_s23  ;;  %v2574_v55 = vpack.i.bf16 %v1355_v52, %v1354_v51 }
 0x99c   : > { %2555 = vrot.lane.b32.xlu1 %v2539_v38, %s2683_s29 }
 0x99e   : > { %2560 = vrot.lane.b32.xlu0 %v2559_v49, %s2684_s30  ;;  %v1621_v49 = vld [vmem:[%s3250_s2 + $0x90] sm:$0xff] }
 0x9a0   : > { %2565 = vrot.lane.b32.xlu1 %v2564_v50, %s2673_s26  ;;  %v2347_v50 = vpack.c.bf16 %v1621_v49, %v1620_v48 }
 0x9a2   : > { %2570 = vrot.lane.b32.xlu0 %v2539_v38, %s2671_s24 }
 0x9a4   : > { %2575 = vrot.lane.b32.xlu1 %v2574_v55, %s2674_s27  ;;  %s2686_s27 = smov 5  }
 0x9f4   : > { %v2203_v53 = vpop.f32.mrb[8].mxu1 }
 0x9f5   : > { %v1304_v57 = vmul.f32 0.0009765625, %v2203_v53  ;;  %v1294_v58 = vpop.f32.mrb[9].mxu1 }
 0x9f6   : > { %v1303_v59 = vmul.f32 0.0009765625, %v1294_v58 }
 0x9f7   : > { %1306 = vst.msk [vmem:[%s2765_s8 + $0x28] sm:$0xff] %vm278_vm2, %v1304_v57 }
 0x9f8   : > { %1305 = vst.msk [vmem:[%s2765_s8 + $0x20] sm:$0xff] %vm278_vm2, %v1303_v59 }
 0xa08   : > { %v2541_v60 = vpop.permute.xlu0 %2540 }
 0xa09   : > { %v2543_v61 = vunpack.i.h.bf16 %v2541_v60  ;;  %v2542_v62 = vunpack.i.l.bf16 %v2541_v60 }
 0xa0a   : > { %v2546_v63 = vpop.permute.xlu1 %2545 }
 0xa0b   : > { %v2318_v0 = vpack.c.bf16 %v2543_v61, %v2542_v62  ;;  %v2548_v1 = vunpack.i.h.bf16 %v2546_v63  ;;  %v2547_v3 = vunpack.i.l.bf16 %v2546_v63  ;;  %v1732_v63 = vld [vmem:[%s3250_s2 + $0xb4] ss:$0 sm:$0xff] }
 0xa0c   : > { %v2551_v4 = vpop.permute.xlu0 %2550 }
 0xa0d   : > { %2319 = vmatpush1.bf16.msra.mxu1 %v2318_v0  ;;  %v2321_v5 = vpack.c.bf16 %v2548_v1, %v2547_v3  ;;  %v2553_v2 = vunpack.i.h.bf16 %v2551_v4  ;;  %v2552_v7 = vunpack.i.l.bf16 %v2551_v4  ;;  %v1733_v0 = vld [vmem:[%s3250_s2 + $0xb5] ss:$0 sm:$0xff] }
 0xa0e   : > { %2320 = vmatprep.subr.bf16.mxu1 %v2685_v25  ;;  %v2556_v8 = vpop.permute.xlu1 %2555 }
 0xa0f   : > { %v2324_v10 = vpack.c.bf16 %v2553_v2, %v2552_v7  ;;  %v2558_v6 = vunpack.i.h.bf16 %v2556_v8  ;;  %v2557_v11 = vunpack.i.l.bf16 %v2556_v8 }
 0xa10   : > { %v2561_v12 = vpop.permute.xlu0 %2560 }
 0xa11   : > { %2322 = vmatpush1.bf16.msra.mxu1 %v2321_v5  ;;  %v2327_v9 = vpack.c.bf16 %v2558_v6, %v2557_v11  ;;  %v2563_v13 = vunpack.i.h.bf16 %v2561_v12  ;;  %v2562_v14 = vunpack.i.l.bf16 %v2561_v12 }
 0xa12   : > { %2323 = vmatprep.subr.bf16.mxu1 %v2685_v25  ;;  %v2566_v15 = vpop.permute.xlu1 %2565 }
 0xa13   : > { %v2330_v18 = vpack.c.bf16 %v2563_v13, %v2562_v14  ;;  %v2568_v17 = vunpack.i.h.bf16 %v2566_v15  ;;  %v2567_v16 = vunpack.i.l.bf16 %v2566_v15 }
 0xa14   : > { %v2571_v19 = vpop.permute.xlu0 %2570 }
 0xa15   : > { %2325 = vmatpush1.bf16.msra.mxu1 %v2324_v10  ;;  %v2333_v20 = vpack.c.bf16 %v2568_v17, %v2567_v16  ;;  %v2573_v21 = vunpack.i.h.bf16 %v2571_v19  ;;  %v2572_v23 = vunpack.i.l.bf16 %v2571_v19 }
 0xa16   : > { %2326 = vmatprep.subr.bf16.mxu1 %v2685_v25  ;;  %v2576_v24 = vpop.permute.xlu1 %2575 }
 0xa17   : > { %v2336_v26 = vpack.c.bf16 %v2573_v21, %v2572_v23  ;;  %v2578_v27 = vunpack.i.h.bf16 %v2576_v24  ;;  %v2577_v28 = vunpack.i.l.bf16 %v2576_v24 }
 0xa19   : > { %2328 = vmatpush1.bf16.msra.mxu1 %v2327_v9  ;;  %v2339_v29 = vpack.c.bf16 %v2578_v27, %v2577_v28 }
 0xa1a   : > { %2329 = vmatprep.subr.bf16.mxu1 %v2685_v25 }
 0xa1d   : > { %2331 = vmatpush1.bf16.msra.mxu1 %v2330_v18 }
 0xa1e   : > { %2332 = vmatprep.subr.bf16.mxu1 %v2685_v25 }
 0xa21   : > { %2334 = vmatpush1.bf16.msra.mxu1 %v2333_v20 }
 0xa22   : > { %2335 = vmatprep.subr.bf16.mxu1 %v2685_v25 }
 0xa25   : > { %2337 = vmatpush1.bf16.msra.mxu1 %v2336_v26 }
 0xa26   : > { %2338 = vmatprep.subr.bf16.mxu1 %v2685_v25 }
 0xa29   : > { %2340 = vmatpush1.bf16.msra.mxu1 %v2339_v29 }
 0xa2a   : > { %1460 = vmatprep.subr.mxu1 %v3159_v30 }
 0xa2d   : > { %1461 = vmatpush1.msra.mxu1 %v2903_v54 }
 0xa2e   : > { %1489 = vmatmul.mubr.f32.vlgmr.msra.gmra.mrb[10].mxu1 %v1309_v31 }
 0xa2f   : > { %2118 = vmatprep.mubr.msk.f32.mxu1 %vm1417_vm6, %v1312_v32  ;;  %v1714_v32 = vld [vmem:[#allocation5 + $0x68] sm:$0xff] }
 0xa32   : > { %1494 = vmatmul.mubr.f32.gmra.mrb[12].mxu1 %v1311_v33 }
 0xb01   : > { %v1490_v34 = vpop.f32.mrb[10].mxu1 }
 0xb02   : > { %1584 = vst.msk [vmem:[%s2765_s8] sm:$0xff] %vm1221_vm1, %v1490_v34  ;;  %v1492_v35 = vpop.f32.mrb[11].mxu1  ;;  %2208 = vmatprep.mubr.msk.f32.mxu0 %vm1221_vm1, %v1490_v34  ;;  %v1586_v36 = vmax.f32 %v1490_v34, 0.0 }
 0xb04   : > { %1590 = vrot.lane.b32.xlu0 %v1586_v36, %s2680_s17 }
 0xb05   : > { %v1495_v37 = vpop.f32.mrb[12].mxu1 }
 0xb06   : > { %v2341_v38 = vpack.c.bf16 %v1495_v37, %v1490_v34  ;;  %1585 = vst.msk [vmem:[%s2765_s8 + $0x8] sm:$0xff] %vm1221_vm1, %v1495_v37  ;;  %v1497_v39 = vpop.f32.mrb[13].mxu1  ;;  %v1587_v54 = vmax.f32 %v1495_v37, 0.0 }
 0xb08   : > { %1592 = vrot.lane.b32.xlu1 %v1587_v54, %s2680_s17  ;;  %2343 = vmatprep.subr.msk.bf16.mxu0 %vm3111_vm4, %v2341_v38 }
 0xb09   : > { %2346 = vmatpush3.bf16.xpose.msk.msra.mxu0 %vm3111_vm4, %v2341_v38 }
 0xb0a   : > { %2349 = vmatprep.subr.msk.bf16.mxu0 %vm3111_vm4, %v2347_v50 }
 0xb10   : > { %2209 = vmatmul.mubr.msk.f32.vlgmr.msra.gmra.mrb[4].mxu0 %vm1221_vm1, %v1495_v37 }
 0xb11   : > { %2352 = vmatpush3.bf16.xpose.msk.msra.mxu0 %vm3111_vm4, %v2347_v50 }
 0xb12   : > { %2353 = vmatprep.subr.bf16.mxu0 %v2685_v25 }
 0xb76   : > { %v1591_v40 = vpop.permute.xlu0 %1590 }
 0xb77   : > { %1596 = vst.msk [vmem:[#allocation3] sm:$0xff] %vm1081_vm0, %v1591_v40 }
 0xb7a   : > { %v1593_v41 = vpop.permute.xlu1 %1592 }
 0xb7b   : > { %1597 = vst.msk [vmem:[#allocation3 + $0x8] sm:$0xff] %vm1081_vm0, %v1593_v41 }
 0xb7e   : > { %v1598_v42 = vld [vmem:[#allocation3] sm:$0xff] }
 0xb7f   : > { %1602 = vrot.lane.b32.xlu0 %v1598_v42, %s2672_s25 }
 0xb82   : > { %v1599_v43 = vld [vmem:[#allocation3 + $0x8] sm:$0xff] }
 0xb83   : > { %1604 = vrot.lane.b32.xlu1 %v1599_v43, %s2672_s25 }
 0xbe3   : > { %v2210_v44 = vpop.f32.mrb[4].mxu0 }
 0xbe4   : > { %v1581_v45 = vmul.f32 0.0009765625, %v2210_v44  ;;  %v1571_v46 = vpop.f32.mrb[5].mxu0 }
 0xbe5   : > { %v1580_v47 = vmul.f32 0.0009765625, %v1571_v46 }
 0xbe6   : > { %1583 = vst.msk [vmem:[%s2765_s8 + $0x38] sm:$0xff] %vm278_vm2, %v1581_v45 }
 0xbe7   : > { %1582 = vst.msk [vmem:[%s2765_s8 + $0x30] sm:$0xff] %vm278_vm2, %v1580_v47 }
 0xbf1   : > { %v1603_v51 = vpop.permute.xlu0 %1602 }
 0xbf2   : > { %v1608_v52 = vmax.f32 %v1598_v42, %v1603_v51 }
 0xbf4   : > { %1612 = vrot.lane.b32.xlu0 %v1608_v52, %s2682_s23 }
 0xbf5   : > { %v1605_v55 = vpop.permute.xlu1 %1604 }
 0xbf6   : > { %v1609_v56 = vmax.f32 %v1599_v43, %v1605_v55 }
 0xbf8   : > { %1614 = vrot.lane.b32.xlu1 %v1609_v56, %s2682_s23 }
 0xc66   : > { %v1613_v53 = vpop.permute.xlu0 %1612 }
 0xc67   : > { %v1618_v57 = vmax.f32 %v1608_v52, %v1613_v53 }
 0xc69   : > { %1624 = vrot.lane.b32.xlu0 %v1618_v57, %s2683_s29 }
 0xc6a   : > { %v1615_v58 = vpop.permute.xlu1 %1614 }
 0xc6b   : > { %v1619_v59 = vmax.f32 %v1609_v56, %v1615_v58 }
 0xc6d   : > { %1626 = vrot.lane.b32.xlu1 %v1619_v59, %s2683_s29 }
 0xcdb   : > { %v1625_v60 = vpop.permute.xlu0 %1624 }
 0xcdc   : > { %2215 = vmatprep.mubr.msk.f32.mxu0 %vm1221_vm1, %v1625_v60 }
 0xcdf   : > { %v1627_v22 = vpop.permute.xlu1 %1626 }
 0xce0   : > { %2216 = vmatmul.mubr.msk.f32.vlgmr.msra.gmra.mrb[6].mxu0 %vm1221_vm1, %v1627_v22 }
 0xce1   : > { %2127 = vmatprep.mubr.msk.f32.mxu0 %vm1417_vm6, %v1714_v32 }
 0xdb3   : > { %v2217_v61 = vpop.f32.mrb[6].mxu0 }
 0xdb4   : > { %1725 = vrot.lane.b32.xlu1 %v2217_v61, %s2686_s27  ;;  %v1704_v62 = vpop.f32.mrb[7].mxu0 }
 0xdb5   : > { %1723 = vrot.lane.b32.xlu0 %v1704_v62, %s2686_s27 }
 0xdb8   : > { %1745 = vrot.lane.b32.xlu1 %v1732_v63, %s2687_s9 }
 0xdb9   : > { %1739 = vrot.lane.b32.xlu0 %v1733_v0, %s2666_s19  ;;  %s2689_s19 = smov 124  }
 0xdbc   : > { %1755 = vrot.lane.b32.xlu1 %v1732_v63, %s2681_s22 }
 0xdbd   : > { %1750 = vrot.lane.b32.xlu0 %v1733_v0, %s2688_s10 }
 0xdc1   : > { %1760 = vrot.lane.b32.xlu0 %v1733_v0, %s2679_s16  ;;  %v1765_v0 = vld [vmem:[%s3250_s2 + $0xa0] sm:$0xff] }
 0xe26   : > { %v1726_v1 = vpop.permute.xlu1 %1725 }
 0xe27   : > { %1731 = vst.msk [vmem:[#allocation4 + $0x8] sm:$0xff] %vm1729_vm7, %v1726_v1  ;;  %v1724_v3 = vpop.permute.xlu0 %1723  ;;  %v1713_v1 = vld [vmem:[#allocation5 + $0x60] sm:$0xff] }
 0xe28   : > { %1730 = vst.msk [vmem:[#allocation4] sm:$0xff] %vm1729_vm7, %v1724_v3  ;;  %v1716_v3 = vld [vmem:[#allocation5 + $0x78] sm:$0xff] }
 0xe2a   : > { %v1746_v5 = vpop.permute.xlu1 %1745 }
 0xe2b   : > { %v1740_v4 = vpop.permute.xlu0 %1739 }
 0xe2e   : > { %v1735_v2 = vld [vmem:[#allocation4 + $0x8] sm:$0xff]  ;;  %v1756_v18 = vpop.permute.xlu1 %1755 }
 0xe2f   : > { %v1734_v7 = vld [vmem:[#allocation4] sm:$0xff]  ;;  %v1743_v8 = vmul.f32 %v1740_v4, %v1735_v2  ;;  %v1737_v10 = vmul.f32 %v1735_v2, %v1732_v63  ;;  %v1749_v12 = vmul.f32 %v1746_v5, %v1735_v2  ;;  %v1751_v9 = vpop.permute.xlu0 %1750  ;;  %v1759_v23 = vmul.f32 %v1756_v18, %v1735_v2 }
 0xe30   : > { %v1742_v6 = vmul.f32 %v1740_v4, %v1734_v7  ;;  %v1748_v11 = vmul.f32 %v1746_v5, %v1734_v7  ;;  %v2579_v13 = vpack.i.bf16 %v1735_v2, %v1734_v7  ;;  %v1736_v14 = vmul.f32 %v1734_v7, %v1732_v63  ;;  %v1715_v4 = vld [vmem:[#allocation5 + $0x70] sm:$0xff]  ;;  %v1718_v5 = vld [vmem:[#allocation5 + $0x88] sm:$0xff] }
 0xe31   : > { %v1753_v19 = vmul.f32 %v1751_v9, %v1734_v7  ;;  %v1754_v20 = vmul.f32 %v1751_v9, %v1735_v2  ;;  %v1758_v21 = vmul.f32 %v1756_v18, %v1734_v7 }
 0xe32   : > { %v2584_v15 = vpack.i.bf16 %v1743_v8, %v1742_v6  ;;  %2580 = vrot.lane.b32.xlu1 %v2579_v13, %s2672_s25  ;;  %v2354_v17 = vpack.c.bf16 %v1737_v10, %v1736_v14  ;;  %v2589_v16 = vpack.i.bf16 %v1749_v12, %v1748_v11  ;;  %s2691_s25 = smov 122  }
 0xe33   : > { %v1761_v24 = vpop.permute.xlu0 %1760  ;;  %v2599_v26 = vpack.i.bf16 %v1754_v20, %v1753_v19  ;;  %v2604_v27 = vpack.i.bf16 %v1759_v23, %v1758_v21 }
 0xe34   : > { %2585 = vrot.lane.b32.xlu0 %v2584_v15, %s2675_s28  ;;  %2355 = vmatpush1.bf16.msra.mxu0 %v2354_v17  ;;  %v1763_v28 = vmul.f32 %v1761_v24, %v1734_v7  ;;  %v1764_v29 = vmul.f32 %v1761_v24, %v1735_v2  ;;  %v1720_v2 = vld [vmem:[#allocation5 + $0x98] sm:$0xff] }
 0xe35   : > { %2356 = vmatprep.subr.bf16.mxu0 %v2685_v25 }
 0xe36   : > { %2590 = vrot.lane.b32.xlu1 %v2589_v16, %s2689_s19  ;;  %v2614_v31 = vpack.i.bf16 %v1764_v29, %v1763_v28 }
 0xe38   : > { %2595 = vrot.lane.b32.xlu0 %v2579_v13, %s2690_s11 }
 0xe3a   : > { %2600 = vrot.lane.b32.xlu1 %v2599_v26, %s2691_s25 }
 0xe3c   : > { %2605 = vrot.lane.b32.xlu0 %v2604_v27, %s2682_s23 }
 0xe3e   : > { %2610 = vrot.lane.b32.xlu1 %v2579_v13, %s2683_s29 }
 0xe40   : > { %2615 = vrot.lane.b32.xlu0 %v2614_v31, %s2684_s30 }
 0xea4   : > { %v2581_v33 = vpop.permute.xlu1 %2580 }
 0xea5   : > { %v2583_v34 = vunpack.i.h.bf16 %v2581_v33  ;;  %v2582_v35 = vunpack.i.l.bf16 %v2581_v33 }
 0xea6   : > { %v2586_v36 = vpop.permute.xlu0 %2585 }
 0xea7   : > { %v2357_v37 = vpack.c.bf16 %v2583_v34, %v2582_v35  ;;  %v2588_v38 = vunpack.i.h.bf16 %v2586_v36  ;;  %v2587_v39 = vunpack.i.l.bf16 %v2586_v36 }
 0xea8   : > { %v2591_v54 = vpop.permute.xlu1 %2590 }
 0xea9   : > { %2358 = vmatpush1.bf16.msra.mxu0 %v2357_v37  ;;  %v2360_v40 = vpack.c.bf16 %v2588_v38, %v2587_v39  ;;  %v2593_v41 = vunpack.i.h.bf16 %v2591_v54  ;;  %v2592_v42 = vunpack.i.l.bf16 %v2591_v54 }
 0xeaa   : > { %2359 = vmatprep.subr.bf16.mxu0 %v2685_v25  ;;  %v2596_v43 = vpop.permute.xlu0 %2595 }
 0xeab   : > { %v2363_v44 = vpack.c.bf16 %v2593_v41, %v2592_v42  ;;  %v2598_v45 = vunpack.i.h.bf16 %v2596_v43  ;;  %v2597_v46 = vunpack.i.l.bf16 %v2596_v43 }
 0xeac   : > { %v2601_v47 = vpop.permute.xlu1 %2600 }
 0xead   : > { %2361 = vmatpush1.bf16.msra.mxu0 %v2360_v40  ;;  %v2366_v48 = vpack.c.bf16 %v2598_v45, %v2597_v46  ;;  %v2603_v49 = vunpack.i.h.bf16 %v2601_v47  ;;  %v2602_v50 = vunpack.i.l.bf16 %v2601_v47 }
 0xeae   : > { %2362 = vmatprep.subr.bf16.mxu0 %v2685_v25  ;;  %v2606_v51 = vpop.permute.xlu0 %2605 }
 0xeaf   : > { %v2369_v52 = vpack.c.bf16 %v2603_v49, %v2602_v50  ;;  %v2608_v55 = vunpack.i.h.bf16 %v2606_v51  ;;  %v2607_v56 = vunpack.i.l.bf16 %v2606_v51 }
 0xeb0   : > { %v2611_v53 = vpop.permute.xlu1 %2610 }
 0xeb1   : > { %2364 = vmatpush1.bf16.msra.mxu0 %v2363_v44  ;;  %v2372_v57 = vpack.c.bf16 %v2608_v55, %v2607_v56  ;;  %v2613_v58 = vunpack.i.h.bf16 %v2611_v53  ;;  %v2612_v59 = vunpack.i.l.bf16 %v2611_v53 }
 0xeb2   : > { %2365 = vmatprep.subr.bf16.mxu0 %v2685_v25  ;;  %v2616_v60 = vpop.permute.xlu0 %2615 }
 0xeb3   : > { %v2375_v22 = vpack.c.bf16 %v2613_v58, %v2612_v59  ;;  %v2618_v61 = vunpack.i.h.bf16 %v2616_v60  ;;  %v2617_v62 = vunpack.i.l.bf16 %v2616_v60 }
 0xeb5   : > { %2367 = vmatpush1.bf16.msra.mxu0 %v2366_v48  ;;  %v2378_v63 = vpack.c.bf16 %v2618_v61, %v2617_v62 }
 0xeb6   : > { %2368 = vmatprep.subr.bf16.mxu0 %v2685_v25 }
 0xeb9   : > { %2370 = vmatpush1.bf16.msra.mxu0 %v2369_v52 }
 0xeba   : > { %2371 = vmatprep.subr.bf16.mxu0 %v2685_v25 }
 0xebd   : > { %2373 = vmatpush1.bf16.msra.mxu0 %v2372_v57 }
 0xebe   : > { %2374 = vmatprep.subr.bf16.mxu0 %v2685_v25 }
 0xec1   : > { %2376 = vmatpush1.bf16.msra.mxu0 %v2375_v22 }
 0xec2   : > { %2377 = vmatprep.subr.bf16.mxu0 %v2685_v25  ;;  %v1717_v25 = vld [vmem:[#allocation5 + $0x80] sm:$0xff] }
 0xec5   : > { %2379 = vmatpush1.bf16.msra.mxu0 %v2378_v63 }
 0xec6   : > { %1874 = vmatprep.subr.mxu0 %v3159_v30  ;;  %v1719_v30 = vld [vmem:[#allocation5 + $0x90] sm:$0xff] }
 0xec9   : > { %1875 = vmatpush1.msra.mxu0 %v1765_v0 }
 0xeca   : > { %1903 = vmatmul.mubr.f32.vlgmr.msra.gmra.mrb[8].mxu0 %v1713_v1 }
 0xecb   : > { %2128 = vmatprep.mubr.msk.f32.mxu0 %vm1417_vm6, %v1716_v3 }
 0xece   : > { %1908 = vmatmul.mubr.f32.gmra.mrb[10].mxu0 %v1715_v4 }
 0xecf   : > { %2129 = vmatprep.mubr.msk.f32.mxu0 %vm1417_vm6, %v1718_v5 }
 0xed2   : > { %1913 = vmatmul.mubr.f32.gmra.mrb[12].mxu0 %v1717_v25 }
 0xed3   : > { %2130 = vmatprep.mubr.msk.f32.mxu0 %vm1417_vm6, %v1720_v2 }
 0xed6   : > { %1918 = vmatmul.mubr.f32.gmra.mrb[14].mxu0 %v1719_v30 }
 0xf9d   : > { %v1904_v7 = vpop.f32.mrb[8].mxu0 }
 0xf9e   : > { %v1906_v8 = vpop.f32.mrb[9].mxu0  ;;  %2226 = vmatprep.mubr.msk.f32.mxu1 %vm278_vm2, %v1904_v7 }
 0xfa1   : > { %v1909_v10 = vpop.f32.mrb[10].mxu0 }
 0xfa2   : > { %v2380_v6 = vpack.c.bf16 %v1909_v10, %v1904_v7  ;;  %v1911_v11 = vpop.f32.mrb[11].mxu0 }
 0xfa4   : > { %2382 = vmatprep.subr.msk.bf16.mxu1 %vm2381_vm8, %v2380_v6 }
 0xfa5   : > { %v1914_v12 = vpop.f32.mrb[12].mxu0  ;;  %2385 = vmatpush3.bf16.xpose.msk.msra.mxu1 %vm2381_vm8, %v2380_v6 }
 0xfa6   : > { %v1916_v9 = vpop.f32.mrb[13].mxu0 }
 0xfa9   : > { %v1919_v13 = vpop.f32.mrb[14].mxu0 }
 0xfaa   : > { %v2386_v14 = vpack.c.bf16 %v1919_v13, %v1914_v12  ;;  %v1921_v15 = vpop.f32.mrb[15].mxu0 }
 0xfac   : > { %2388 = vmatprep.subr.msk.bf16.mxu1 %vm2381_vm8, %v2386_v14 }
 0xfad   : > { %2391 = vmatpush3.bf16.xpose.msk.msra.mxu1 %vm2381_vm8, %v2386_v14 }
 0xfb4   : > { %2227 = vmatmul.mubr.msk.f32.vlgmr.msra.gmra.mrb[14].mxu1 %vm278_vm2, %v1909_v10 }
 0xfb5   : > { %2229 = vmatprep.mubr.msk.f32.mxu1 %vm278_vm2, %v1914_v12 }
 0xfb8   : > { %2230 = vmatmul.mubr.msk.f32.gmra.mrb[16].mxu1 %vm278_vm2, %v1919_v13 }
0x1087   : > { %v2228_v18 = vpop.f32.mrb[14].mxu1 }
0x1088   : > { %v2021_v17 = vmul.f32 0.001953125, %v2228_v18  ;;  %v2001_v16 = vpop.f32.mrb[15].mxu1 }
0x1089   : > { %v2020_v19 = vmul.f32 0.001953125, %v2001_v16 }
0x108a   : > { %2025 = vst.msk [vmem:[%s2765_s8 + $0x48] sm:$0xff] %vm302_vm5, %v2021_v17 }
0x108b   : > { %2024 = vst.msk [vmem:[%s2765_s8 + $0x40] sm:$0xff] %vm302_vm5, %v2020_v19  ;;  %v2231_v20 = vpop.f32.mrb[16].mxu1 }
0x108c   : > { %v2023_v21 = vmul.f32 0.001953125, %v2231_v20  ;;  %v2011_v23 = vpop.f32.mrb[17].mxu1 }
0x108d   : > { %v2022_v24 = vmul.f32 0.001953125, %v2011_v23 }
0x108e   : > { %2027 = vst.msk [vmem:[%s2765_s8 + $0x58] sm:$0xff] %vm302_vm5, %v2023_v21 }
0x108f   : > { %2026 = vst.msk [vmem:[%s2765_s8 + $0x50] sm:$0xff] %vm302_vm5, %v2022_v24 }
0x1090 PF: > { %s14_s12 = sadd.s32 1, %s2658_s12  }
0x1091   : > { %p11_p3 = scmp.ge.s32.totalorder %s14_s12, 4  }
0x1093   :  { %13 = sbr.rel (!%p11_p3) target bundleno = 1 (0x1), region = 69 }
0x109a   :  { %2049 = vsyncpa [#allocation6], 1 }
0x109b   :  { %2051 = vsyncpa [#allocation6 + $0x1], 1 }

</bundles_post_ra>
